<compile_context>
chip_gen: v6e
topology: v6e:2x2x1
jax: 0.10.0
libtpu: 0.0.40
codegen_flags: <defaults>
</compile_context>

<pallas_src>
import functools

import jax
import jax.numpy as jnp
import numpy as np
from jax.experimental import pallas as pl
from jax.experimental.pallas import tpu as pltpu

BN_EPS = 1e-5


def _round_up(v, m):
    return ((v + m - 1) // m) * m


def _nl_block_kernel(x_ref, w_all_ref, b_all_ref, wz_ref, out_ref, *,
                     ci_pad, b_tile):
    # x_ref block: (b_tile, C, S) -- channels-first, lane axis = S.
    w_all = w_all_ref[...]                        # (3*ci_pad, C)  f32
    wz = wz_ref[...]                              # (C, ci_pad)    f32; BN + b_z folded
    s_len = x_ref.shape[-1]
    # Hoist the (rows,1)->(rows,S) bias broadcast out of the batch loop
    # (JAX does not CSE broadcast_in_dim).
    b_all = jnp.broadcast_to(b_all_ref[...], (w_all.shape[0], s_len))

    def body(b, carry):
        x = x_ref[b]                              # (C, S) f32

        # Fused theta/phi/g 1x1-conv projections: one MXU matmul, lanes = S.
        proj = jnp.dot(w_all, x, preferred_element_type=jnp.float32) + b_all

        # bf16 operands for the two O(S^2) matmuls (MXU-native), f32 accum.
        theta = proj[0 * ci_pad:1 * ci_pad, :].astype(jnp.bfloat16)  # (ci_pad, S)
        phi = proj[1 * ci_pad:2 * ci_pad, :].astype(jnp.bfloat16)    # (ci_pad, S)
        g = proj[2 * ci_pad:3 * ci_pad, :].astype(jnp.bfloat16)      # (ci_pad, S); last row == 1

        # fT[t, s] = f[s, t] = sum_c theta[c, s] phi[c, t] (embedded Gaussian).
        # Transposed logits keep both attention matmuls transpose-free on the
        # (S, S) operand and make max/sum axis-0 reductions.
        fT = jax.lax.dot_general(phi, theta, (((0,), (0,)), ((), ())),
                                 preferred_element_type=jnp.float32)  # (S_t, S_s)

        m = jnp.max(fT, axis=0, keepdims=True)     # (1, S) lane-dense
        pT = jnp.exp(fT - m)                       # (S_t, S_s) unnormalized, f32

        # y_un[c, s] = sum_t g[c, t] pT[t, s]; g's all-ones padded row makes
        # y_un's last row the softmax denominator l[s] for free.
        y_un = jnp.dot(g, pT.astype(jnp.bfloat16),
                       preferred_element_type=jnp.float32)            # (ci_pad, S)

        l = y_un[ci_pad - 1:ci_pad, :]                                # (1, S)
        inv_l = pl.reciprocal(l, approx=True)
        inv_l = inv_l * (2.0 - l * inv_l)          # one Newton step -> ~exact f32
        y = y_un * inv_l                           # (ci_pad, S); last row == 1

        # W_z projection (eval-mode BN and bias folded into wz; the bias rides
        # the all-ones last row of y) + residual.
        out_ref[b] = jnp.dot(wz, y, preferred_element_type=jnp.float32) + x
        return carry

    jax.lax.fori_loop(0, b_tile, body, 0, unroll=True)


def fuse_nl_params(params, bn_eps=BN_EPS):
    """Precompute the fused / padded weights ONCE (hoisted out of forward)."""
    Ci, C = params["w_g"].shape
    f32 = jnp.float32
    # +1 reserves a padded all-ones row in g that carries the softmax denom.
    ci_pad = _round_up(Ci + 1, 8)

    def pad_w(w):                                  # (Ci, C) -> (ci_pad, C)
        return jnp.zeros((ci_pad, C), f32).at[:Ci, :].set(w.astype(f32))

    def pad_b(b, ones_last=False):                 # (1, Ci) -> (ci_pad, 1)
        out = jnp.zeros((ci_pad, 1), f32).at[:Ci, 0].set(b.reshape(-1).astype(f32))
        if ones_last:
            out = out.at[ci_pad - 1, 0].set(1.0)
        return out

    w_all = jnp.concatenate(
        [pad_w(params["w_theta"]), pad_w(params["w_phi"]), pad_w(params["w_g"])],
        axis=0)                                                    # (3*ci_pad, C)
    b_all = jnp.concatenate(
        [pad_b(params["b_theta"]), pad_b(params["b_phi"]),
         pad_b(params["b_g"], ones_last=True)], axis=0)            # (3*ci_pad, 1)

    # Fold eval-mode BatchNorm (running stats) into W_z; fold the resulting
    # bias into wz's last column (it multiplies y's all-ones last row).
    gamma = params["bn_gamma"].reshape(-1).astype(f32)
    beta = params["bn_beta"].reshape(-1).astype(f32)
    mean = params["bn_mean"].reshape(-1).astype(f32)
    var = params["bn_var"].reshape(-1).astype(f32)
    scale = gamma * jax.lax.rsqrt(var + bn_eps)                    # (C,)
    wz_f = params["w_z"].astype(f32) * scale[:, None]              # (C, Ci)
    bz_f = (params["b_z"].reshape(-1).astype(f32) - mean) * scale + beta

    wz_fused = (jnp.zeros((C, ci_pad), f32)
                .at[:, :Ci].set(wz_f)
                .at[:, ci_pad - 1].set(bz_f))
    return {"w_all": w_all, "b_all": b_all, "wz": wz_fused}


def _pick_batch_tile(n):
    # Amortize the ~0.35us Pallas per-step overhead by processing several batch
    # elements per grid step (the grid is a serial loop on v5e/v6e anyway).
    for cand in (8, 4, 2, 1):
        if n % cand == 0:
            return cand
    return 1


def nl_block_forward(x_nchw, fused):
    """NLBlockND.forward_self (embedded, dim=2, bn_layer=True) in Pallas."""
    N, C, H, W = x_nchw.shape
    S = H * W
    w_all, b_all, wz = fused["w_all"], fused["b_all"], fused["wz"]
    ci_pad = wz.shape[1]
    assert w_all.shape == (3 * ci_pad, C)

    # Channels-first, lane-dense activations: pure reshape -- no pad, no
    # transpose, no output slice -> no extra HBM passes around the kernel.
    x = x_nchw.reshape(N, C, S).astype(jnp.float32)

    b_tile = _pick_batch_tile(N)
    grid = (N // b_tile,)

    def full_spec(arr):
        nd = arr.ndim
        return pl.BlockSpec(arr.shape, lambda b, _nd=nd: (0,) * _nd)

    # Rough per-step VMEM: the (S,S) logits (f32 fT + f32 pT + bf16 pT) plus
    # double-buffered x/out blocks; be explicit only when the smallest scoped
    # default (v5e: 16 MiB) would be exceeded.
    vmem_need = 10 * S * S + 32 * b_tile * C * S + (2 << 20)
    cp = dict(dimension_semantics=("parallel",))
    if vmem_need > (16 << 20):
        cp["vmem_limit_bytes"] = min(vmem_need, 64 << 20)

    out = pl.pallas_call(
        functools.partial(_nl_block_kernel, ci_pad=ci_pad, b_tile=b_tile),
        out_shape=jax.ShapeDtypeStruct((N, C, S), jnp.float32),
        grid=grid,
        in_specs=[pl.BlockSpec((b_tile, C, S), lambda b: (b, 0, 0)),
                  full_spec(w_all), full_spec(b_all), full_spec(wz)],
        out_specs=pl.BlockSpec((b_tile, C, S), lambda b: (b, 0, 0)),
        compiler_params=pltpu.CompilerParams(**cp),
    )(x, w_all, b_all, wz)

    return out.reshape(N, C, H, W)


def nl_block_reference(x, p):
    """Pure-JAX reference matching the PyTorch forward_self (embedded mode)."""
    N, C, H, W = x.shape
    S = H * W
    xf = x.reshape(N, C, S)

    def conv1x1(inp, w, b):  # inp (N, Cin, S), w (Cout, Cin), b (Cout,)
        return jnp.einsum('ncs,oc->nos', inp, w) + b[None, :, None]

    g_x = conv1x1(xf, p["w_g"], p["b_g"].reshape(-1)).transpose(0, 2, 1)
    theta_x = conv1x1(xf, p["w_theta"], p["b_theta"].reshape(-1)).transpose(0, 2, 1)
    phi_x = conv1x1(xf, p["w_phi"], p["b_phi"].reshape(-1))
    f = jnp.einsum('nsc,nct->nst', theta_x, phi_x)
    f_div_c = jax.nn.softmax(f, axis=-1)
    y = jnp.einsum('nst,ntc->nsc', f_div_c, g_x).transpose(0, 2, 1)  # (N, Ci, S)
    w_y = conv1x1(y, p["w_z"], p["b_z"].reshape(-1))                 # (N, C, S)
    gamma = p["bn_gamma"].reshape(-1)
    beta = p["bn_beta"].reshape(-1)
    mean = p["bn_mean"].reshape(-1)
    var = p["bn_var"].reshape(-1)
    w_y = (w_y - mean[None, :, None]) / jnp.sqrt(var[None, :, None] + BN_EPS) \
          * gamma[None, :, None] + beta[None, :, None]
    return (w_y + xf).reshape(N, C, H, W)


def make_params(key, in_channels, inter_channels):
    ks = jax.random.split(key, 10)
    C, Ci = in_channels, inter_channels
    sc = 0.1
    return {
        "w_g":     sc * jax.random.normal(ks[0], (Ci, C), jnp.float32),
        "b_g":     sc * jax.random.normal(ks[1], (1, Ci), jnp.float32),
        "w_theta": sc * jax.random.normal(ks[2], (Ci, C), jnp.float32),
        "b_theta": sc * jax.random.normal(ks[3], (1, Ci), jnp.float32),
        "w_phi":   sc * jax.random.normal(ks[4], (Ci, C), jnp.float32),
        "b_phi":   sc * jax.random.normal(ks[5], (1, Ci), jnp.float32),
        "w_z":     sc * jax.random.normal(ks[6], (C, Ci), jnp.float32),
        "b_z":     sc * jax.random.normal(ks[7], (1, C), jnp.float32),
        # PyTorch init: gamma=0, beta=0 (identity block).  Non-zero here so the
        # computed branch is actually tested.
        "bn_gamma": 1.0 + sc * jax.random.normal(ks[8], (1, C), jnp.float32),
        "bn_beta":  sc * jax.random.normal(ks[9], (1, C), jnp.float32),
        "bn_mean":  jnp.zeros((1, C), jnp.float32),
        "bn_var":   jnp.ones((1, C), jnp.float32),
    }


if __name__ == "__main__":
    key = jax.random.PRNGKey(0)
    k_x, k_p = jax.random.split(key)

    N, C, H, W = 2, 4, 16, 16          # dimension=2 -> (N, C, H, W)
    Ci = max(C // 2, 1)                # inter_channels = in_channels // 2

    x = jax.random.normal(k_x, (N, C, H, W), jnp.float32)
    params = make_params(k_p, C, Ci)

    # Weight fusion / padding / BN fold done ONCE, outside the forward path.
    fused = fuse_nl_params(params)

    fwd = jax.jit(nl_block_forward)
    z = jax.block_until_ready(fwd(x, fused))

    z_ref = nl_block_reference(x, params)
    # Tolerance covers the bf16 operands of the two attention matmuls (f32
    # accumulation); the softmax reciprocal is Newton-refined to ~f32 exact.
    np.testing.assert_allclose(np.asarray(z), np.asarray(z_ref),
                               rtol=2e-3, atol=2e-3)
    print("KERNEL_OK")
</pallas_src>

<mosaic_0001>
module attributes {stable_mosaic.version = 11 : i64} {
  func.func @_nl_block_kernel(%arg0: i32, %arg1: memref<2x4x256xf32, #tpu.memory_space<vmem>>, %arg2: memref<24x4xf32, #tpu.memory_space<vmem>>, %arg3: memref<24x1xf32, #tpu.memory_space<vmem>>, %arg4: memref<4x8xf32, #tpu.memory_space<vmem>>, %arg5: memref<2x4x256xf32, #tpu.memory_space<vmem>>) attributes {dimension_semantics = [#tpu.dimension_semantics<parallel>], iteration_bounds = array<i64: 1>, scalar_prefetch = 0 : i64, scratch_operands = 0 : i64, tpu.core_type = #tpu.core_type<tc>, window_params = [{transform_indices = @transform_0, window_bounds = array<i64: 2, 4, 256>}, {pipeline_mode = #tpu.pipeline_mode<synchronous>, transform_indices = @transform_1, window_bounds = array<i64: 24, 4>}, {pipeline_mode = #tpu.pipeline_mode<synchronous>, transform_indices = @transform_2, window_bounds = array<i64: 24, 1>}, {pipeline_mode = #tpu.pipeline_mode<synchronous>, transform_indices = @transform_3, window_bounds = array<i64: 4, 8>}, {transform_indices = @transform_4, window_bounds = array<i64: 2, 4, 256>}]} {
    %c0 = arith.constant 0 : index
    %c0_0 = arith.constant 0 : index
    %0 = vector.load %arg2[%c0, %c0_0] : memref<24x4xf32, #tpu.memory_space<vmem>>, vector<24x4xf32>
    %c0_1 = arith.constant 0 : index
    %c0_2 = arith.constant 0 : index
    %1 = vector.load %arg4[%c0_1, %c0_2] : memref<4x8xf32, #tpu.memory_space<vmem>>, vector<4x8xf32>
    %c0_3 = arith.constant 0 : index
    %c0_4 = arith.constant 0 : index
    %2 = vector.load %arg3[%c0_3, %c0_4] : memref<24x1xf32, #tpu.memory_space<vmem>>, vector<24x1xf32>
    %3 = vector.shape_cast %2 : vector<24x1xf32> to vector<24x1xf32>
    %4 = vector.broadcast %3 : vector<24x1xf32> to vector<24x256xf32>
    %c0_i32 = arith.constant 0 : i32
    %5 = arith.index_cast %c0_i32 : i32 to index
    %c0_5 = arith.constant 0 : index
    %c0_6 = arith.constant 0 : index
    %6 = vector.load %arg1[%5, %c0_5, %c0_6] : memref<2x4x256xf32, #tpu.memory_space<vmem>>, vector<1x4x256xf32>
    %7 = vector.shape_cast %6 : vector<1x4x256xf32> to vector<4x256xf32>
    %cst = arith.constant dense<0.000000e+00> : vector<24x256xf32>
    %8 = tpu.matmul %0, %7, %cst {dimension_numbers = #tpu.dot_dimension_numbers<[1], [0], [0], [1], [0, 0, 1, 1], [], []>} : vector<24x4xf32>, vector<4x256xf32>, vector<24x256xf32> -> vector<24x256xf32>
    %9 = arith.addf %8, %4 : vector<24x256xf32>
    %10 = vector.extract_strided_slice %9 {offsets = [0, 0], sizes = [8, 256], strides = [1, 1]} : vector<24x256xf32> to vector<8x256xf32>
    %11 = arith.truncf %10 : vector<8x256xf32> to vector<8x256xbf16>
    %12 = vector.extract_strided_slice %9 {offsets = [8, 0], sizes = [8, 256], strides = [1, 1]} : vector<24x256xf32> to vector<8x256xf32>
    %13 = arith.truncf %12 : vector<8x256xf32> to vector<8x256xbf16>
    %14 = vector.extract_strided_slice %9 {offsets = [16, 0], sizes = [8, 256], strides = [1, 1]} : vector<24x256xf32> to vector<8x256xf32>
    %15 = arith.truncf %14 : vector<8x256xf32> to vector<8x256xbf16>
    %cst_7 = arith.constant dense<0.000000e+00> : vector<256x256xf32>
    %16 = tpu.matmul %13, %11, %cst_7 {dimension_numbers = #tpu.dot_dimension_numbers<[0], [0], [1], [1], [0, 1, 1, 1], [], []>} : vector<8x256xbf16>, vector<8x256xbf16>, vector<256x256xf32> -> vector<256x256xf32>
    %cst_8 = arith.constant dense<0xFF800000> : vector<256xf32>
    %17 = vector.multi_reduction <maximumf>, %16, %cst_8 [0] : vector<256x256xf32> to vector<256xf32>
    %18 = vector.shape_cast %17 : vector<256xf32> to vector<1x256xf32>
    %19 = vector.broadcast %18 : vector<1x256xf32> to vector<256x256xf32>
    %20 = arith.subf %16, %19 : vector<256x256xf32>
    %21 = math.exp %20 : vector<256x256xf32>
    %22 = arith.truncf %21 : vector<256x256xf32> to vector<256x256xbf16>
    %cst_9 = arith.constant dense<0.000000e+00> : vector<8x256xf32>
    %23 = tpu.matmul %15, %22, %cst_9 {dimension_numbers = #tpu.dot_dimension_numbers<[1], [0], [0], [1], [0, 0, 1, 1], [], []>} : vector<8x256xbf16>, vector<256x256xbf16>, vector<8x256xf32> -> vector<8x256xf32>
    %24 = vector.extract_strided_slice %23 {offsets = [7, 0], sizes = [1, 256], strides = [1, 1]} : vector<8x256xf32> to vector<1x256xf32>
    %25 = tpu.reciprocal %24 {approx = true} : vector<1x256xf32> -> vector<1x256xf32>
    %26 = arith.mulf %24, %25 : vector<1x256xf32>
    %cst_10 = arith.constant 2.000000e+00 : f32
    %27 = vector.broadcast %cst_10 : f32 to vector<1x256xf32>
    %28 = arith.subf %27, %26 : vector<1x256xf32>
    %29 = arith.mulf %25, %28 : vector<1x256xf32>
    %30 = vector.broadcast %29 : vector<1x256xf32> to vector<8x256xf32>
    %31 = arith.mulf %23, %30 : vector<8x256xf32>
    %cst_11 = arith.constant dense<0.000000e+00> : vector<4x256xf32>
    %32 = tpu.matmul %1, %31, %cst_11 {dimension_numbers = #tpu.dot_dimension_numbers<[1], [0], [0], [1], [0, 0, 1, 1], [], []>} : vector<4x8xf32>, vector<8x256xf32>, vector<4x256xf32> -> vector<4x256xf32>
    %33 = arith.addf %32, %7 : vector<4x256xf32>
    %34 = arith.index_cast %c0_i32 : i32 to index
    %c0_12 = arith.constant 0 : index
    %c0_13 = arith.constant 0 : index
    %35 = vector.load %arg5[%34, %c0_12, %c0_13] : memref<2x4x256xf32, #tpu.memory_space<vmem>>, vector<1x4x256xf32>
    %36 = vector.shape_cast %35 : vector<1x4x256xf32> to vector<4x256xf32>
    %37 = vector.shape_cast %33 : vector<4x256xf32> to vector<1x4x256xf32>
    tpu.vector_store %arg5[%34, %c0_12, %c0_13], %37 {strides = array<i32>} : memref<2x4x256xf32, #tpu.memory_space<vmem>>, vector<1x4x256xf32>,
    %c1_i32 = arith.constant 1 : i32
    %38 = arith.index_cast %c1_i32 : i32 to index
    %c0_14 = arith.constant 0 : index
    %c0_15 = arith.constant 0 : index
    %39 = vector.load %arg1[%38, %c0_14, %c0_15] : memref<2x4x256xf32, #tpu.memory_space<vmem>>, vector<1x4x256xf32>
    %40 = vector.shape_cast %39 : vector<1x4x256xf32> to vector<4x256xf32>
    %cst_16 = arith.constant dense<0.000000e+00> : vector<24x256xf32>
    %41 = tpu.matmul %0, %40, %cst_16 {dimension_numbers = #tpu.dot_dimension_numbers<[1], [0], [0], [1], [0, 0, 1, 1], [], []>} : vector<24x4xf32>, vector<4x256xf32>, vector<24x256xf32> -> vector<24x256xf32>
    %42 = arith.addf %41, %4 : vector<24x256xf32>
    %43 = vector.extract_strided_slice %42 {offsets = [0, 0], sizes = [8, 256], strides = [1, 1]} : vector<24x256xf32> to vector<8x256xf32>
    %44 = arith.truncf %43 : vector<8x256xf32> to vector<8x256xbf16>
    %45 = vector.extract_strided_slice %42 {offsets = [8, 0], sizes = [8, 256], strides = [1, 1]} : vector<24x256xf32> to vector<8x256xf32>
    %46 = arith.truncf %45 : vector<8x256xf32> to vector<8x256xbf16>
    %47 = vector.extract_strided_slice %42 {offsets = [16, 0], sizes = [8, 256], strides = [1, 1]} : vector<24x256xf32> to vector<8x256xf32>
    %48 = arith.truncf %47 : vector<8x256xf32> to vector<8x256xbf16>
    %cst_17 = arith.constant dense<0.000000e+00> : vector<256x256xf32>
    %49 = tpu.matmul %46, %44, %cst_17 {dimension_numbers = #tpu.dot_dimension_numbers<[0], [0], [1], [1], [0, 1, 1, 1], [], []>} : vector<8x256xbf16>, vector<8x256xbf16>, vector<256x256xf32> -> vector<256x256xf32>
    %cst_18 = arith.constant dense<0xFF800000> : vector<256xf32>
    %50 = vector.multi_reduction <maximumf>, %49, %cst_18 [0] : vector<256x256xf32> to vector<256xf32>
    %51 = vector.shape_cast %50 : vector<256xf32> to vector<1x256xf32>
    %52 = vector.broadcast %51 : vector<1x256xf32> to vector<256x256xf32>
    %53 = arith.subf %49, %52 : vector<256x256xf32>
    %54 = math.exp %53 : vector<256x256xf32>
    %55 = arith.truncf %54 : vector<256x256xf32> to vector<256x256xbf16>
    %cst_19 = arith.constant dense<0.000000e+00> : vector<8x256xf32>
    %56 = tpu.matmul %48, %55, %cst_19 {dimension_numbers = #tpu.dot_dimension_numbers<[1], [0], [0], [1], [0, 0, 1, 1], [], []>} : vector<8x256xbf16>, vector<256x256xbf16>, vector<8x256xf32> -> vector<8x256xf32>
    %57 = vector.extract_strided_slice %56 {offsets = [7, 0], sizes = [1, 256], strides = [1, 1]} : vector<8x256xf32> to vector<1x256xf32>
    %58 = tpu.reciprocal %57 {approx = true} : vector<1x256xf32> -> vector<1x256xf32>
    %59 = arith.mulf %57, %58 : vector<1x256xf32>
    %cst_20 = arith.constant 2.000000e+00 : f32
    %60 = vector.broadcast %cst_20 : f32 to vector<1x256xf32>
    %61 = arith.subf %60, %59 : vector<1x256xf32>
    %62 = arith.mulf %58, %61 : vector<1x256xf32>
    %63 = vector.broadcast %62 : vector<1x256xf32> to vector<8x256xf32>
    %64 = arith.mulf %56, %63 : vector<8x256xf32>
    %cst_21 = arith.constant dense<0.000000e+00> : vector<4x256xf32>
    %65 = tpu.matmul %1, %64, %cst_21 {dimension_numbers = #tpu.dot_dimension_numbers<[1], [0], [0], [1], [0, 0, 1, 1], [], []>} : vector<4x8xf32>, vector<8x256xf32>, vector<4x256xf32> -> vector<4x256xf32>
    %66 = arith.addf %65, %40 : vector<4x256xf32>
    %67 = arith.index_cast %c1_i32 : i32 to index
    %c0_22 = arith.constant 0 : index
    %c0_23 = arith.constant 0 : index
    %68 = vector.load %arg5[%67, %c0_22, %c0_23] : memref<2x4x256xf32, #tpu.memory_space<vmem>>, vector<1x4x256xf32>
    %69 = vector.shape_cast %68 : vector<1x4x256xf32> to vector<4x256xf32>
    %70 = vector.shape_cast %66 : vector<4x256xf32> to vector<1x4x256xf32>
    tpu.vector_store %arg5[%67, %c0_22, %c0_23], %70 {strides = array<i32>} : memref<2x4x256xf32, #tpu.memory_space<vmem>>, vector<1x4x256xf32>,
    %c2_i32 = arith.constant 2 : i32
    return
  }
  func.func @transform_0(%arg0: i32) -> (i32, i32, i32) {
    %c0_i32 = arith.constant 0 : i32
    %c0_i32_0 = arith.constant 0 : i32
    %c0_i32_1 = arith.constant 0 : i32
    return %arg0, %c0_i32, %c0_i32_0 : i32, i32, i32
  }
  func.func @transform_1(%arg0: i32) -> (i32, i32) {
    %c0_i32 = arith.constant 0 : i32
    %c0_i32_0 = arith.constant 0 : i32
    %c0_i32_1 = arith.constant 0 : i32
    return %c0_i32, %c0_i32_0 : i32, i32
  }
  func.func @transform_2(%arg0: i32) -> (i32, i32) {
    %c0_i32 = arith.constant 0 : i32
    %c0_i32_0 = arith.constant 0 : i32
    %c0_i32_1 = arith.constant 0 : i32
    return %c0_i32, %c0_i32_0 : i32, i32
  }
  func.func @transform_3(%arg0: i32) -> (i32, i32) {
    %c0_i32 = arith.constant 0 : i32
    %c0_i32_0 = arith.constant 0 : i32
    %c0_i32_1 = arith.constant 0 : i32
    return %c0_i32, %c0_i32_0 : i32, i32
  }
  func.func @transform_4(%arg0: i32) -> (i32, i32, i32) {
    %c0_i32 = arith.constant 0 : i32
    %c0_i32_0 = arith.constant 0 : i32
    %c0_i32_1 = arith.constant 0 : i32
    return %arg0, %c0_i32, %c0_i32_0 : i32, i32, i32
  }
}

</mosaic_0001>

<bundles_post_ra>
// kernel: nl_block_forward.1
= control target key start
LH: loop header
LB: loop body
LE: loop exit
PB: predicated region body
PF: predicated region fallthrough
CT: control target
= control target key end

     0   :  { %vm53_vm0 = vcmask 1043456   ;;  %v3012_v1 = vmov 0.0   ;;  %v3010_v2 = vmov 0   ;;  %vm43_vm1 = vcmask 31744   ;;  %s3005_s0 = inlined_call_operand.vmem [shape: f32[2,4,256], index: 0, kind: input, shape index: {}]   ;;  %s3006_s1 = inlined_call_operand.vmem [shape: f32[24,4], index: 1, kind: input, shape index: {}]   ;;  %s3007_s2 = inlined_call_operand.vmem [shape: f32[24,1], index: 2, kind: input, shape index: {}]   ;;  %s3008_s3 = inlined_call_operand.vmem [shape: f32[4,8], index: 3, kind: input, shape index: {}]   ;;  %s3009_s4 = inlined_call_operand.vmem [shape: f32[2,4,256], index: 4, kind: output, shape index: {}]  }
   0x1   :  { %v40_v0 = vld [vmem:[%s3005_s0] sm:$0xff]  ;;  %122 = vmatprep.mubr.f32.mxu1 %v3012_v1  ;;  %1729 = vset.pattern.permute.xlu0 %v3010_v2  ;;  %v23_v4 = vld [vmem:[%s3007_s2 + $0x8] sm:$0xff]  ;;  %v24_v8 = vld [vmem:[%s3007_s2 + $0x10] sm:$0xff]  ;;  %vm179_vm2 = vcmask 64512  }
   0x2   :  { %v2034_v3 = vcombine.high %v40_v0, %v40_v0  ;;  %852 = vmatprep.mubr.f32.mxu0 %v3012_v1  ;;  %v18_v5 = vld [vmem:[%s3006_s1] sm:$0xff]  ;;  %32 = vperm.xlu0 %1729, %v23_v4   ;;  %v19_v7 = vld [vmem:[%s3006_s1 + $0x8] sm:$0xff]  ;;  %v20_v9 = vld [vmem:[%s3006_s1 + $0x10] sm:$0xff] }
   0x3   :  { %v22_v6 = vld [vmem:[%s3007_s2] sm:$0xff] }
   0x4   :  { %3063 = vst [vmem:[#allocation2_spill] sm:$0xff] %v2034_v3  ;;  %1679 = vmatprep.subr.msk.mxu1 %vm53_vm0, %v2034_v3 }
   0x5   :  { %1680 = vmatpush1.msk.msra.mxu1 %vm53_vm0, %v40_v0 }
   0x6   :  { %1681 = vmatmul.mubr.msk.f32.vlgmr.msra.gmra.mxu1 %vm43_vm1, %v18_v5  ;;  %27 = vperm.xlu0 %1729, %v22_v6  }
   0x7   :  { %128 = vmatprep.mubr.f32.mxu1 %v3012_v1 }
   0xa   :  { %1682 = vmatmul.mubr.msk.f32.gmra.mxu1 %vm43_vm1, %v19_v7  ;;  %37 = vperm.xlu0 %1729, %v24_v8  }
   0xb   :  { %134 = vmatprep.mubr.f32.mxu1 %v3012_v1 }
   0xe   :  { %1683 = vmatmul.mubr.msk.f32.gmra.mxu1 %vm43_vm1, %v20_v9 }
   0xf   :  { %266 = vmatprep.mubr.bf16.mxu1 %v3010_v2 }
  0x7d   :  { %v2064_v10 = vpop.permute.xlu0 %32 }
  0x7e   :  { %3064 = vst [vmem:[#allocation3_spill] sm:$0xff] %v2064_v10 }
  0x81   :  { %v2066_v11 = vpop.permute.xlu0 %27 }
  0x82   :  { %3065 = vst [vmem:[#allocation4_spill] sm:$0xff] %v2066_v11 }
  0x85   :  { %v2106_v42 = vpop.permute.xlu0 %37 }
  0x86   :  { %3067 = vst [vmem:[#allocation6_spill] sm:$0xff] %v2106_v42 }
  0xc6   :  { %v124_v12 = vpop.f32.mrf.mxu1 }
  0xc7   :  { %v125_v13 = vadd.f32 %v124_v12, %v2066_v11 }
  0xc8   :  { %v126_v14 = vpop.f32.mrf.mxu1 }
  0xc9   :  { %v141_v15 = vpack.c.bf16 %v125_v13, %v125_v13  ;;  %v127_v16 = vadd.f32 %v126_v14, %v2066_v11 }
  0xca   :  { %v130_v17 = vpop.f32.mrf.mxu1 }
  0xcb   :  { %v142_v18 = vpack.c.bf16 %v127_v16, %v127_v16  ;;  %v131_v19 = vadd.f32 %v130_v17, %v2064_v10  ;;  %v229_v20 = vsel %vm53_vm0, %v141_v15, 0 }
  0xcc   :  { %v132_v22 = vpop.f32.mrf.mxu1 }
  0xcd   :  { %1684 = vmatprep.subr.msk.bf16.mxu1 %vm53_vm0, %v142_v18  ;;  %v143_v21 = vpack.c.bf16 %v131_v19, %v131_v19  ;;  %v133_v23 = vadd.f32 %v132_v22, %v2064_v10 }
  0xce   :  { %249 = vmatpush1.bf16.msra.mxu1 %v229_v20  ;;  %v2102_v39 = vpop.f32.mrf.mxu1 }
  0xcf   :  { %147 = vxpose.xlu1.c.b16.start.end [1/1] (short) %v143_v21, 128  ;;  %v144_v24 = vpack.c.bf16 %v133_v23, %v133_v23  ;;  %3066 = vst [vmem:[#allocation5_spill] sm:$0xff] %v2102_v39 }
  0xd0   :  { %v138_v41 = vpop.f32.mrf.mxu1 }
  0xd1   :  { %v139_v43 = vadd.f32 %v138_v41, %v2106_v42 }
  0xd3   :  { %v146_v45 = vpack.c.bf16 %v139_v43, %v139_v43 }
  0xec   :  { %163 = vxpose.xlu1.c.b16.start.end [1/1] (short) %v144_v24, 128 }
 0x131   :  { %v155_v25 = vpop.trf.xlu1 }
 0x132   :  { %1685 = vmatmul.mubr.msk.bf16.vlgmr.msra.gmra.mxu1 %vm179_vm2, %v155_v25 }
 0x133   :  { %276 = vmatprep.mubr.bf16.mxu1 %v3010_v2 }
 0x135   :  { %v156_v26 = vpop.trf.xlu1 }
 0x139   :  { %v157_v27 = vpop.trf.xlu1 }
 0x13a   :  { %1686 = vmatmul.mubr.msk.bf16.gmra.mxu1 %vm179_vm2, %v156_v26 }
 0x13b   :  { %286 = vmatprep.mubr.bf16.mxu1 %v3010_v2 }
 0x13d   :  { %v158_v28 = vpop.trf.xlu1 }
 0x141   :  { %v159_v29 = vpop.trf.xlu1 }
 0x142   :  { %1687 = vmatmul.mubr.msk.bf16.gmra.mxu1 %vm179_vm2, %v157_v27 }
 0x143   :  { %296 = vmatprep.mubr.bf16.mxu1 %v3010_v2 }
 0x145   :  { %v160_v30 = vpop.trf.xlu1 }
 0x149   :  { %v161_v31 = vpop.trf.xlu1 }
 0x14a   :  { %1688 = vmatmul.mubr.msk.bf16.gmra.mxu1 %vm179_vm2, %v158_v28 }
 0x14b   :  { %306 = vmatprep.mubr.bf16.mxu1 %v3010_v2 }
 0x14d   :  { %v162_v32 = vpop.trf.xlu1 }
 0x151   :  { %v171_v33 = vpop.trf.xlu1 }
 0x152   :  { %1689 = vmatmul.mubr.msk.bf16.gmra.mxu1 %vm179_vm2, %v159_v29 }
 0x153   :  { %316 = vmatprep.mubr.bf16.mxu1 %v3010_v2 }
 0x155   :  { %v172_v34 = vpop.trf.xlu1 }
 0x159   :  { %v173_v35 = vpop.trf.xlu1 }
 0x15a   :  { %1690 = vmatmul.mubr.msk.bf16.gmra.mxu1 %vm179_vm2, %v160_v30 }
 0x15b   :  { %326 = vmatprep.mubr.bf16.mxu1 %v3010_v2 }
 0x15d   :  { %v174_v36 = vpop.trf.xlu1 }
 0x161   :  { %v175_v37 = vpop.trf.xlu1 }
 0x162   :  { %1691 = vmatmul.mubr.msk.bf16.gmra.mxu1 %vm179_vm2, %v161_v31 }
 0x163   :  { %336 = vmatprep.mubr.bf16.mxu1 %v3010_v2 }
 0x165   :  { %v176_v38 = vpop.trf.xlu1 }
 0x169   :  { %v177_v40 = vpop.trf.xlu1 }
 0x16a   :  { %1692 = vmatmul.mubr.msk.bf16.gmra.mxu1 %vm179_vm2, %v162_v32 }
 0x16b   :  { %346 = vmatprep.mubr.bf16.mxu1 %v3010_v2 }
 0x16d   :  { %v178_v44 = vpop.trf.xlu1 }
 0x172   :  { %1693 = vmatmul.mubr.msk.bf16.gmra.mxu1 %vm179_vm2, %v171_v33 }
 0x173   :  { %356 = vmatprep.mubr.bf16.mxu1 %v3010_v2 }
 0x17a   :  { %1694 = vmatmul.mubr.msk.bf16.gmra.mxu1 %vm179_vm2, %v172_v34 }
 0x17b   :  { %366 = vmatprep.mubr.bf16.mxu1 %v3010_v2 }
 0x182   :  { %1695 = vmatmul.mubr.msk.bf16.gmra.mxu1 %vm179_vm2, %v173_v35 }
 0x183   :  { %376 = vmatprep.mubr.bf16.mxu1 %v3010_v2 }
 0x18a   :  { %1696 = vmatmul.mubr.msk.bf16.gmra.mxu1 %vm179_vm2, %v174_v36 }
 0x18b   :  { %386 = vmatprep.mubr.bf16.mxu1 %v3010_v2 }
 0x192   :  { %1697 = vmatmul.mubr.msk.bf16.gmra.mxu1 %vm179_vm2, %v175_v37 }
 0x193   :  { %396 = vmatprep.mubr.bf16.mxu1 %v3010_v2 }
 0x19a   :  { %1698 = vmatmul.mubr.msk.bf16.gmra.mxu1 %vm179_vm2, %v176_v38 }
 0x19b   :  { %406 = vmatprep.mubr.bf16.mxu1 %v3010_v2 }
 0x1a2   :  { %1699 = vmatmul.mubr.msk.bf16.gmra.mxu1 %vm179_vm2, %v177_v40 }
 0x1a3   :  { %416 = vmatprep.mubr.bf16.mxu1 %v3010_v2 }
 0x1aa   :  { %1700 = vmatmul.mubr.msk.bf16.gmra.mxu1 %vm179_vm2, %v178_v44 }
 0x1ab   :  { %757 = vmatprep.mubr.bf16.mxu1 %v146_v45 }
 0x1f2   :  { %v2110_v46 = vpop.f32.mrf.mxu1 }
 0x1f3   :  { %3068 = vst [vmem:[#allocation7_spill] sm:$0xff] %v2110_v46 }
 0x1f4   :  { %v2112_v47 = vpop.f32.mrf.mxu1 }
 0x1f6   :  { %v2114_v48 = vpop.f32.mrf.mxu1 }
 0x1f7   :  { %3069 = vst [vmem:[#allocation8_spill] sm:$0xff] %v2114_v48 }
 0x1f8   :  { %v2116_v49 = vpop.f32.mrf.mxu1 }
 0x1fa   :  { %v2118_v50 = vpop.f32.mrf.mxu1 }
 0x1fb   :  { %v427_v45 = vmax.f32 %v2110_v46, %v2118_v50 }
 0x1fc   :  { %v2120_v51 = vpop.f32.mrf.mxu1 }
 0x1fd   :  { %3070 = vst [vmem:[#allocation9_spill] sm:$0xff] %v2120_v51 }
 0x1fe   :  { %v2122_v52 = vpop.f32.mrf.mxu1 }
 0x1ff   :  { %3071 = vst [vmem:[#allocation10_spill] sm:$0xff] %v2122_v52  ;;  %v428_v43 = vmax.f32 %v2114_v48, %v2122_v52 }
 0x200   :  { %v2124_v53 = vpop.f32.mrf.mxu1 }
 0x201   :  { %3072 = vst [vmem:[#allocation11_spill] sm:$0xff] %v2124_v53  ;;  %v465_v52 = vmax.f32 %v2116_v49, %v2124_v53 }
 0x202   :  { %v2126_v54 = vpop.f32.mrf.mxu1 }
 0x203   :  { %v429_v10 = vmax.f32 %v427_v45, %v2126_v54 }
 0x204   :  { %v2128_v55 = vpop.f32.mrf.mxu1 }
 0x206   :  { %v2130_v56 = vpop.f32.mrf.mxu1 }
 0x207   :  { %3073 = vst [vmem:[#allocation12_spill] sm:$0xff] %v2130_v56  ;;  %v430_v2 = vmax.f32 %v428_v43, %v2130_v56 }
 0x208   :  { %v2132_v57 = vpop.f32.mrf.mxu1 }
 0x209   :  { %3074 = vst [vmem:[#allocation13_spill] sm:$0xff] %v2132_v57  ;;  %v467_v45 = vmax.f32 %v465_v52, %v2132_v57 }
 0x20a   :  { %v2134_v58 = vpop.f32.mrf.mxu1 }
 0x20b   :  { %v431_v39 = vmax.f32 %v429_v10, %v2134_v58 }
 0x20c   :  { %v2136_v59 = vpop.f32.mrf.mxu1 }
 0x20e   :  { %v2138_v60 = vpop.f32.mrf.mxu1 }
 0x20f   :  { %3075 = vst [vmem:[#allocation14_spill] sm:$0xff] %v2138_v60  ;;  %v432_v11 = vmax.f32 %v430_v2, %v2138_v60  ;;  %v464_v2 = vmax.f32 %v2112_v47, %v2120_v51 }
 0x210   :  { %v2140_v61 = vpop.f32.mrf.mxu1 }
 0x211   :  { %v469_v60 = vmax.f32 %v467_v45, %v2140_v61 }
 0x212   :  { %v2142_v62 = vpop.f32.mrf.mxu1 }
 0x213   :  { %v433_v46 = vmax.f32 %v431_v39, %v2142_v62 }
 0x214   :  { %v2144_v63 = vpop.f32.mrf.mxu1 }
 0x216   :  { %v2146_v0 = vpop.f32.mrf.mxu1 }
 0x217   :  { %3076 = vst [vmem:[#allocation15_spill] sm:$0xff] %v2146_v0  ;;  %v434_v42 = vmax.f32 %v432_v11, %v2146_v0  ;;  %v466_v0 = vmax.f32 %v464_v2, %v2128_v55 }
 0x218   :  { %v2148_v4 = vpop.f32.mrf.mxu1 }
 0x219   :  { %v471_v51 = vmax.f32 %v469_v60, %v2148_v4 }
 0x21a   :  { %v2150_v5 = vpop.f32.mrf.mxu1 }
 0x21b   :  { %v435_v10 = vmax.f32 %v433_v46, %v2150_v5 }
 0x21c   :  { %v2152_v6 = vpop.f32.mrf.mxu1 }
 0x21e   :  { %v2154_v7 = vpop.f32.mrf.mxu1 }
 0x21f   :  { %3077 = vst [vmem:[#allocation16_spill] sm:$0xff] %v2154_v7  ;;  %v436_v43 = vmax.f32 %v434_v42, %v2154_v7  ;;  %v468_v7 = vmax.f32 %v466_v0, %v2136_v59 }
 0x220   :  { %v2156_v8 = vpop.f32.mrf.mxu1 }
 0x221   :  { %v473_v2 = vmax.f32 %v471_v51, %v2156_v8 }
 0x222   :  { %v2158_v9 = vpop.f32.mrf.mxu1 }
 0x223   :  { %v437_v53 = vmax.f32 %v435_v10, %v2158_v9 }
 0x224   :  { %v2160_v12 = vpop.f32.mrf.mxu1 }
 0x226   :  { %v2162_v13 = vpop.f32.mrf.mxu1 }
 0x227   :  { %v438_v11 = vmax.f32 %v436_v43, %v2162_v13  ;;  %v470_v43 = vmax.f32 %v468_v7, %v2144_v63 }
 0x228   :  { %v2164_v14 = vpop.f32.mrf.mxu1 }
 0x229   :  { %v475_v0 = vmax.f32 %v473_v2, %v2164_v14 }
 0x22a   :  { %v2166_v15 = vpop.f32.mrf.mxu1 }
 0x22b   :  { %v439_v52 = vmax.f32 %v437_v53, %v2166_v15 }
 0x22c   :  { %v2168_v16 = vpop.f32.mrf.mxu1 }
 0x22e   :  { %v2170_v17 = vpop.f32.mrf.mxu1 }
 0x22f   :  { %v440_v39 = vmax.f32 %v438_v11, %v2170_v17  ;;  %v472_v11 = vmax.f32 %v470_v43, %v2152_v6 }
 0x230   :  { %v2172_v18 = vpop.f32.mrf.mxu1 }
 0x231   :  { %v477_v7 = vmax.f32 %v475_v0, %v2172_v18 }
 0x232   :  { %v2174_v19 = vpop.f32.mrf.mxu1 }
 0x233   :  { %3078 = vst [vmem:[#allocation17_spill] sm:$0xff] %v2174_v19  ;;  %v441_v45 = vmax.f32 %v439_v52, %v2174_v19 }
 0x234   :  { %v2176_v20 = vpop.f32.mrf.mxu1 }
 0x235   :  { %3079 = vst [vmem:[#allocation18_spill] sm:$0xff] %v2176_v20 }
 0x236   :  { %v2178_v21 = vpop.f32.mrf.mxu1 }
 0x237   :  { %3080 = vst [vmem:[#allocation19_spill] sm:$0xff] %v2178_v21  ;;  %v442_v46 = vmax.f32 %v440_v39, %v2178_v21  ;;  %v474_v39 = vmax.f32 %v472_v11, %v2160_v12 }
 0x238   :  { %v2180_v22 = vpop.f32.mrf.mxu1 }
 0x239   :  { %3081 = vst [vmem:[#allocation20_spill] sm:$0xff] %v2180_v22  ;;  %v479_v43 = vmax.f32 %v477_v7, %v2180_v22 }
 0x23a   :  { %v2182_v23 = vpop.f32.mrf.mxu1 }
 0x23b   :  { %3082 = vst [vmem:[#allocation21_spill] sm:$0xff] %v2182_v23  ;;  %v443_v60 = vmax.f32 %v441_v45, %v2182_v23 }
 0x23c   :  { %v2184_v24 = vpop.f32.mrf.mxu1 }
 0x23e   :  { %v2186_v25 = vpop.f32.mrf.mxu1 }
 0x23f   :  { %3083 = vst [vmem:[#allocation22_spill] sm:$0xff] %v2186_v25  ;;  %v444_v10 = vmax.f32 %v442_v46, %v2186_v25  ;;  %v476_v46 = vmax.f32 %v474_v39, %v2168_v16 }
 0x240   :  { %v2188_v26 = vpop.f32.mrf.mxu1 }
 0x241   :  { %3084 = vst [vmem:[#allocation23_spill] sm:$0xff] %v2188_v26  ;;  %v481_v11 = vmax.f32 %v479_v43, %v2188_v26 }
 0x242   :  { %v2190_v27 = vpop.f32.mrf.mxu1 }
 0x243   :  { %3085 = vst [vmem:[#allocation24_spill] sm:$0xff] %v2190_v27  ;;  %v445_v51 = vmax.f32 %v443_v60, %v2190_v27  ;;  %v3087_v27 = vld [vmem:[#allocation10_spill] sm:$0xff] }
 0x244   :  { %v2192_v28 = vpop.f32.mrf.mxu1 }
 0x246   :  { %v2194_v29 = vpop.f32.mrf.mxu1 }
 0x247   :  { %3086 = vst [vmem:[#allocation25_spill] sm:$0xff] %v2194_v29  ;;  %v446_v53 = vmax.f32 %v444_v10, %v2194_v29  ;;  %v478_v10 = vmax.f32 %v476_v46, %v2176_v20 }
 0x248   :  { %v2196_v30 = vpop.f32.mrf.mxu1 }
 0x249   :  { %v483_v39 = vmax.f32 %v481_v11, %v2196_v30 }
 0x24a   :  { %v2198_v31 = vpop.f32.mrf.mxu1 }
 0x24b   :  { %v447_v2 = vmax.f32 %v445_v51, %v2198_v31 }
 0x24c   :  { %v2200_v32 = vpop.f32.mrf.mxu1 }
 0x24e   :  { %v2202_v33 = vpop.f32.mrf.mxu1 }
 0x24f   :  { %v448_v52 = vmax.f32 %v446_v53, %v2202_v33  ;;  %v480_v53 = vmax.f32 %v478_v10, %v2184_v24 }
 0x250   :  { %v2204_v34 = vpop.f32.mrf.mxu1 }
 0x251   :  { %v485_v46 = vmax.f32 %v483_v39, %v2204_v34 }
 0x252   :  { %v2206_v35 = vpop.f32.mrf.mxu1 }
 0x253   :  { %v449_v0 = vmax.f32 %v447_v2, %v2206_v35 }
 0x254   :  { %v2208_v36 = vpop.f32.mrf.mxu1 }
 0x256   :  { %v2210_v37 = vpop.f32.mrf.mxu1 }
 0x257   :  { %v450_v45 = vmax.f32 %v448_v52, %v2210_v37  ;;  %v482_v52 = vmax.f32 %v480_v53, %v2192_v28 }
 0x258   :  { %v2212_v38 = vpop.f32.mrf.mxu1 }
 0x259   :  { %v487_v22 = vmax.f32 %v485_v46, %v2212_v38 }
 0x25a   :  { %v2214_v40 = vpop.f32.mrf.mxu1 }
 0x25b   :  { %v451_v7 = vmax.f32 %v449_v0, %v2214_v40 }
 0x25c   :  { %v2216_v41 = vpop.f32.mrf.mxu1 }
 0x25e   :  { %v2220_v44 = vpop.f32.mrf.mxu1 }
 0x25f   :  { %v452_v60 = vmax.f32 %v450_v45, %v2220_v44  ;;  %v484_v45 = vmax.f32 %v482_v52, %v2200_v32 }
 0x260   :  { %v2225_v1 = vpop.f32.mrf.mxu1 }
 0x261   :  { %v486_v11 = vmax.f32 %v484_v45, %v2208_v36  ;;  %v489_v0 = vmax.f32 %v487_v22, %v2225_v1 }
 0x262   :  { %v2229_v3 = vpop.f32.mrf.mxu1 }
 0x263   :  { %v453_v43 = vmax.f32 %v451_v7, %v2229_v3  ;;  %v488_v53 = vmax.f32 %v486_v11, %v2216_v41 }
 0x264   :  { %v2233_v48 = vpop.f32.mrf.mxu1 }
 0x265   :  { %v490_v7 = vmax.f32 %v488_v53, %v2233_v48 }
 0x266   :  { %v2239_v56 = vpop.f32.mrf.mxu1 }
 0x267   :  { %v454_v51 = vmax.f32 %v452_v60, %v2239_v56 }
 0x268   :  { %v2250_v42 = vpop.f32.mrf.mxu1 }
 0x269   :  { %v491_v39 = vmax.f32 %v489_v0, %v2250_v42 }
 0x26a   :  { %v2260_v57 = vpop.f32.mrf.mxu1 }
 0x26b   :  { %v455_v10 = vmax.f32 %v453_v43, %v2260_v57 }
 0x26c   :  { %v2270_v21 = vpop.f32.mrf.mxu1 }
 0x26d   :  { %v492_v46 = vmax.f32 %v490_v7, %v2270_v21  ;;  %v3088_v7 = vld [vmem:[#allocation12_spill] sm:$0xff] }
 0x26e   :  { %v2280_v19 = vpop.f32.mrf.mxu1 }
 0x26f   :  { %v456_v2 = vmax.f32 %v454_v51, %v2280_v19 }
 0x270   :  { %v2295_v60 = vpop.f32.mrf.mxu1 }
 0x271   :  { %v457_v25 = vmax.f32 %v455_v10, %v456_v2  ;;  %v493_v52 = vmax.f32 %v491_v39, %v2295_v60 }
 0x273   :  { %v458_v51 = vrot.slane %v457_v25, 4  ;;  %v494_v43 = vmax.f32 %v492_v46, %v493_v52  ;;  %v3089_v52 = vld [vmem:[#allocation14_spill] sm:$0xff] }
 0x275   :  { %v459_v23 = vmax.f32 %v457_v25, %v458_v51  ;;  %v495_v45 = vrot.slane %v494_v43, 4 }
 0x277   :  { %v460_v20 = vrot.slane %v459_v23, 2  ;;  %v496_v22 = vmax.f32 %v494_v43, %v495_v45  ;;  %v3090_v45 = vld [vmem:[#allocation15_spill] sm:$0xff] }
 0x279   :  { %v461_v26 = vmax.f32 %v459_v23, %v460_v20  ;;  %v497_v10 = vrot.slane %v496_v22, 2 }
 0x27b   :  { %v462_v2 = vrot.slane %v461_v26, 1  ;;  %v498_v11 = vmax.f32 %v496_v22, %v497_v10 }
 0x27d   :  { %v2302_v29 = vmax.f32 %v461_v26, %v462_v2  ;;  %v499_v53 = vrot.slane %v498_v11, 1 }
 0x27f   :  { %v505_v0 = vsub.f32 %v2118_v50, %v2302_v29  ;;  %v507_v39 = vsub.f32 %v3087_v27, %v2302_v29  ;;  %v509_v25 = vsub.f32 %v2126_v54, %v2302_v29  ;;  %v511_v51 = vsub.f32 %v3088_v7, %v2302_v29 }
 0x280   :  { %v513_v20 = vsub.f32 %v2134_v58, %v2302_v29  ;;  %v2314_v23 = vmax.f32 %v498_v11, %v499_v53  ;;  %v515_v46 = vsub.f32 %v3089_v52, %v2302_v29  ;;  %v517_v43 = vsub.f32 %v2142_v62, %v2302_v29 }
 0x281   :  { %v573_v26 = vmul.f32 1.442695, %v505_v0  ;;  %v577_v50 = vmul.f32 1.442695, %v507_v39  ;;  %v581_v27 = vmul.f32 1.442695, %v509_v25  ;;  %v519_v54 = vsub.f32 %v3090_v45, %v2302_v29 }
 0x282   :  { %v585_v22 = vmul.f32 1.442695, %v511_v51  ;;  %v502_v2 = vsub.f32 %v2112_v47, %v2314_v23  ;;  %v589_v10 = vmul.f32 1.442695, %v513_v20  ;;  %v504_v58 = vsub.f32 %v2116_v49, %v2314_v23 }
 0x283   :  { %1732 = vpow2.f32 %v573_v26  ;;  %v593_v11 = vmul.f32 1.442695, %v515_v46  ;;  %v526_v0 = vsub.f32 %v2160_v12, %v2314_v23  ;;  %v597_v53 = vmul.f32 1.442695, %v517_v43 }
 0x284   :  { %1734 = vpow2.f32 %v577_v50  ;;  %v528_v62 = vsub.f32 %v2164_v14, %v2314_v23  ;;  %v601_v39 = vmul.f32 1.442695, %v519_v54  ;;  %v529_v47 = vsub.f32 %v2166_v15, %v2302_v29  ;;  %v3091_v54 = vld [vmem:[#allocation16_spill] sm:$0xff] }
 0x285   :  { %1736 = vpow2.f32 %v581_v27  ;;  %v567_v25 = vmul.f32 1.442695, %v502_v2  ;;  %v530_v49 = vsub.f32 %v2168_v16, %v2314_v23  ;;  %v571_v7 = vmul.f32 1.442695, %v504_v58 }
 0x286   :  { %1738 = vpow2.f32 %v585_v22  ;;  %v531_v12 = vsub.f32 %v2170_v17, %v2302_v29  ;;  %v615_v51 = vmul.f32 1.442695, %v526_v0  ;;  %v532_v14 = vsub.f32 %v2172_v18, %v2314_v23 }
 0x287   :  { %1740 = vpow2.f32 %v589_v10  ;;  %v619_v20 = vmul.f32 1.442695, %v528_v62  ;;  %v522_v15 = vsub.f32 %v2152_v6, %v2314_v23  ;;  %v621_v26 = vmul.f32 1.442695, %v529_v47  ;;  %v3093_v62 = vld [vmem:[#allocation11_spill] sm:$0xff] }
 0x288   :  { %1742 = vpow2.f32 %v593_v11  ;;  %v525_v16 = vsub.f32 %v2158_v9, %v2302_v29  ;;  %v623_v52 = vmul.f32 1.442695, %v530_v49  ;;  %v527_v17 = vsub.f32 %v2162_v13, %v2302_v29 }
 0x289   :  { %1744 = vpow2.f32 %v597_v53  ;;  %v625_v46 = vmul.f32 1.442695, %v531_v12  ;;  %v524_v18 = vsub.f32 %v2156_v8, %v2314_v23  ;;  %v627_v50 = vmul.f32 1.442695, %v532_v14 }
 0x28a   :  { %1746 = vpow2.f32 %v601_v39  ;;  %v518_v6 = vsub.f32 %v2144_v63, %v2314_v23  ;;  %v607_v43 = vmul.f32 1.442695, %v522_v15  ;;  %v521_v9 = vsub.f32 %v2150_v5, %v2302_v29  ;;  %v3092_v5 = vld [vmem:[#allocation9_spill] sm:$0xff] }
 0x28b   :  { %1748 = vpow2.f32 %v567_v25  ;;  %v613_v45 = vmul.f32 1.442695, %v525_v16  ;;  %v523_v22 = vsub.f32 %v3091_v54, %v2302_v29  ;;  %v617_v8 = vmul.f32 1.442695, %v527_v17 }
 0x28c   :  { %1750 = vpow2.f32 %v571_v7  ;;  %v520_v63 = vsub.f32 %v2148_v4, %v2314_v23  ;;  %v611_v10 = vmul.f32 1.442695, %v524_v18  ;;  %v506_v11 = vsub.f32 %v3092_v5, %v2314_v23  ;;  %v3094_v18 = vld [vmem:[#allocation13_spill] sm:$0xff] }
 0x28d   :  { %1752 = vpow2.f32 %v615_v51  ;;  %v599_v0 = vmul.f32 1.442695, %v518_v6  ;;  %v508_v39 = vsub.f32 %v3093_v62, %v2314_v23  ;;  %v605_v47 = vmul.f32 1.442695, %v521_v9 }
 0x28e   :  { %1754 = vpow2.f32 %v619_v20  ;;  %v514_v4 = vsub.f32 %v2136_v59, %v2314_v23  ;;  %v609_v49 = vmul.f32 1.442695, %v523_v22  ;;  %v516_v12 = vsub.f32 %v2140_v61, %v2314_v23 }
 0x28f   :  { %1756 = vpow2.f32 %v621_v26  ;;  %v603_v51 = vmul.f32 1.442695, %v520_v63  ;;  %v545_v20 = vsub.f32 %v2198_v31, %v2302_v29  ;;  %v575_v15 = vmul.f32 1.442695, %v506_v11 }
 0x290   :  { %v2348_v27 = vpop.eup %1732  ;;  %1758 = vpow2.f32 %v623_v52  ;;  %v510_v59 = vsub.f32 %v2128_v55, %v2314_v23  ;;  %v579_v16 = vmul.f32 1.442695, %v508_v39  ;;  %v547_v61 = vsub.f32 %v2202_v33, %v2302_v29 }
 0x291   :  { %v2352_v13 = vpop.eup %1734  ;;  %1760 = vpow2.f32 %v625_v46  ;;  %v591_v17 = vmul.f32 1.442695, %v514_v4  ;;  %v512_v31 = vsub.f32 %v3094_v18, %v2314_v23  ;;  %v653_v55 = vmul.f32 1.442695, %v545_v20 }
 0x292   :  { %v2356_v2 = vpop.eup %1736  ;;  %1762 = vpow2.f32 %v627_v50  ;;  %v595_v50 = vmul.f32 1.442695, %v516_v12  ;;  %v583_v33 = vmul.f32 1.442695, %v510_v59  ;;  %v551_v22 = vsub.f32 %v2210_v37, %v2302_v29 }
 0x293   :  { %v2360_v58 = vpop.eup %1738  ;;  %1764 = vpow2.f32 %v607_v43  ;;  %v549_v43 = vsub.f32 %v2206_v35, %v2302_v29  ;;  %v587_v5 = vmul.f32 1.442695, %v512_v31  ;;  %v553_v11 = vsub.f32 %v2214_v40, %v2302_v29 }
 0x294   :  { %v2364_v53 = vpop.eup %1740  ;;  %1766 = vpow2.f32 %v613_v45  ;;  %v550_v45 = vsub.f32 %v2208_v36, %v2314_v23  ;;  %v554_v62 = vsub.f32 %v2216_v41, %v2314_v23  ;;  %v555_v4 = vsub.f32 %v2220_v44, %v2302_v29  ;;  %v3095_v44 = vld [vmem:[#allocation7_spill] sm:$0xff] }
 0x295   :  { %v2368_v25 = vpop.eup %1742  ;;  %1768 = vpow2.f32 %v617_v8  ;;  %v657_v8 = vmul.f32 1.442695, %v547_v61  ;;  %v556_v40 = vsub.f32 %v2225_v1, %v2314_v23  ;;  %v563_v41 = vsub.f32 %v2280_v19, %v2302_v29  ;;  %v3096_v1 = vld [vmem:[#allocation8_spill] sm:$0xff] }
 0x296   :  { %v2372_v7 = vpop.eup %1744  ;;  %1770 = vpow2.f32 %v611_v10  ;;  %v552_v10 = vsub.f32 %v2212_v38, %v2314_v23  ;;  %v663_v37 = vmul.f32 1.442695, %v550_v45  ;;  %v665_v38 = vmul.f32 1.442695, %v551_v22 }
 0x297   :  { %v2376_v14 = vpop.eup %1746  ;;  %1772 = vpow2.f32 %v599_v0  ;;  %v661_v0 = vmul.f32 1.442695, %v549_v43  ;;  %v669_v59 = vmul.f32 1.442695, %v553_v11  ;;  %v501_v61 = vsub.f32 %v3095_v44, %v2302_v29 }
 0x298   :  { %v2380_v26 = vpop.eup %1748  ;;  %1774 = vpow2.f32 %v605_v47  ;;  %v503_v31 = vsub.f32 %v3096_v1, %v2302_v29  ;;  %v564_v19 = vsub.f32 %v2295_v60, %v2314_v23  ;;  %v675_v43 = vmul.f32 1.442695, %v556_v40 }
 0x299   :  { %v2384_v52 = vpop.eup %1750  ;;  %1776 = vpow2.f32 %v609_v49  ;;  %v689_v45 = vmul.f32 1.442695, %v563_v41  ;;  %v562_v22 = vsub.f32 %v2270_v21, %v2314_v23  ;;  %v561_v60 = vsub.f32 %v2260_v57, %v2302_v29 }
 0x29a   :  { %v1753_v46 = vpop.eup %1752  ;;  %1778 = vpow2.f32 %v603_v51  ;;  %v667_v51 = vmul.f32 1.442695, %v552_v10  ;;  %v569_v10 = vmul.f32 1.442695, %v503_v31  ;;  %v691_v11 = vmul.f32 1.442695, %v564_v19 }
 0x29b   :  { %v1755_v6 = vpop.eup %1754  ;;  %1780 = vpow2.f32 %v575_v15  ;;  %v687_v57 = vmul.f32 1.442695, %v562_v22  ;;  %v548_v1 = vsub.f32 %v2204_v34, %v2314_v23  ;;  %v695_v34 = vpack.c.bf16 %v2352_v13, %v2348_v27  ;;  %v3098_v27 = vld [vmem:[#allocation25_spill] sm:$0xff] }
 0x29c   :  { %v1757_v9 = vpop.eup %1756  ;;  %1782 = vpow2.f32 %v579_v16  ;;  %v706_v20 = vpack.c.bf16 %v1755_v6, %v1753_v46  ;;  %v543_v13 = vsub.f32 %v3098_v27, %v2302_v29 }
 0x29d   :  { %v1759_v54 = vpop.eup %1758  ;;  %1784 = vpow2.f32 %v591_v17  ;;  %v671_v17 = vmul.f32 1.442695, %v554_v62 }
 0x29e   :  { %v1761_v63 = vpop.eup %1760  ;;  %1786 = vpow2.f32 %v595_v50  ;;  %v673_v50 = vmul.f32 1.442695, %v555_v4  ;;  %v685_v4 = vmul.f32 1.442695, %v561_v60 }
 0x29f   :  { %v1763_v35 = vpop.eup %1762  ;;  %1788 = vpow2.f32 %v653_v55  ;;  %v707_v49 = vpack.c.bf16 %v1761_v63, %v1757_v9 }
 0x2a0   :  { %v1765_v36 = vpop.eup %1764  ;;  %1790 = vpow2.f32 %v583_v33  ;;  %v708_v39 = vpack.c.bf16 %v1763_v35, %v1759_v54  ;;  %v558_v33 = vsub.f32 %v2233_v48, %v2314_v23  ;;  %v560_v48 = vsub.f32 %v2250_v42, %v2314_v23 }
 0x2a1   :  { %v1767_v47 = vpop.eup %1766  ;;  %1792 = vpow2.f32 %v657_v8  ;;  %v565_v8 = vmul.f32 1.442695, %v501_v61  ;;  %v701_v42 = vpack.c.bf16 %v2376_v14, %v2372_v7  ;;  %v699_v7 = vpack.c.bf16 %v2368_v25, %v2364_v53 }
 0x2a2   :  { %v1769_v12 = vpop.eup %1768  ;;  %1794 = vpow2.f32 %v587_v5  ;;  %725 = vmatprep.subr.bf16.mxu1 %v708_v39  ;;  %v679_v21 = vmul.f32 1.442695, %v558_v33  ;;  %v546_v53 = vsub.f32 %v2200_v32, %v2314_v23  ;;  %v697_v25 = vpack.c.bf16 %v2360_v58, %v2356_v2 }
 0x2a3   :  { %v1771_v15 = vpop.eup %1770  ;;  %1796 = vpow2.f32 %v661_v0  ;;  %726 = vmatpush1.bf16.msra.mxu1 %v707_v49  ;;  %v705_v46 = vpack.c.bf16 %v1769_v12, %v1767_v47  ;;  %v559_v47 = vsub.f32 %v2239_v56, %v2302_v29  ;;  %v683_v49 = vmul.f32 1.442695, %v560_v48 }
 0x2a4   :  { %v1773_v16 = vpop.eup %1772  ;;  %1798 = vpow2.f32 %v663_v37  ;;  %727 = vmatprep.subr.bf16.mxu1 %v706_v20  ;;  %v704_v55 = vpack.c.bf16 %v1771_v15, %v1765_v36  ;;  %v557_v37 = vsub.f32 %v2229_v3, %v2302_v29  ;;  %v542_v2 = vsub.f32 %v2192_v28, %v2314_v23  ;;  %v3097_v28 = vld [vmem:[#allocation24_spill] sm:$0xff] }
 0x2a5   :  { %v1775_v18 = vpop.eup %1774  ;;  %1800 = vpow2.f32 %v665_v38  ;;  %v681_v15 = vmul.f32 1.442695, %v559_v47  ;;  %v655_v58 = vmul.f32 1.442695, %v546_v53 }
 0x2a6   :  { %v1777_v6 = vpop.eup %1776  ;;  %1802 = vpow2.f32 %v667_v51  ;;  %v677_v20 = vmul.f32 1.442695, %v557_v37  ;;  %v647_v60 = vmul.f32 1.442695, %v542_v2 }
 0x2a7   :  { %v1779_v9 = vpop.eup %1778  ;;  %1804 = vpow2.f32 %v669_v59  ;;  %728 = vmatpush1.bf16.msra.mxu1 %v705_v46  ;;  %v703_v5 = vpack.c.bf16 %v1777_v6, %v1775_v18 }
 0x2a8   :  { %v2416_v54 = vpop.eup %1780  ;;  %1806 = vpow2.f32 %v671_v17  ;;  %729 = vmatprep.subr.bf16.mxu1 %v704_v55  ;;  %v702_v0 = vpack.c.bf16 %v1779_v9, %v1773_v16  ;;  %v544_v55 = vsub.f32 %v2196_v30, %v2314_v23  ;;  %v659_v9 = vmul.f32 1.442695, %v548_v1 }
 0x2a9   :  { %v1783_v63 = vpop.eup %1782  ;;  %1808 = vpow2.f32 %v673_v50 }
 0x2aa   :  { %v1785_v35 = vpop.eup %1784  ;;  %1810 = vpow2.f32 %v675_v43  ;;  %v696_v31 = vpack.c.bf16 %v1783_v63, %v2416_v54  ;;  %v538_v54 = vsub.f32 %v2184_v24, %v2314_v23 }
 0x2ab   :  { %v1787_v36 = vpop.eup %1786  ;;  %1812 = vpow2.f32 %v689_v45  ;;  %730 = vmatpush1.bf16.msra.mxu1 %v703_v5  ;;  %v694_v45 = vpack.c.bf16 %v2384_v52, %v2380_v26  ;;  %v3099_v26 = vld [vmem:[#allocation23_spill] sm:$0xff]  ;;  %v651_v5 = vmul.f32 1.442695, %v544_v55 }
 0x2ac   :  { %v2424_v62 = vpop.eup %1788  ;;  %1814 = vpow2.f32 %v565_v8  ;;  %731 = vmatprep.subr.bf16.mxu1 %v702_v0  ;;  %v700_v12 = vpack.c.bf16 %v1787_v36, %v1785_v35  ;;  %v541_v8 = vsub.f32 %v3097_v28, %v2302_v29  ;;  %v540_v52 = vsub.f32 %v3099_v26, %v2314_v23  ;;  %v3101_v36 = vld [vmem:[#allocation21_spill] sm:$0xff] }
 0x2ad   :  { %v1791_v39 = vpop.eup %1790  ;;  %1816 = vpow2.f32 %v569_v10  ;;  %v639_v0 = vmul.f32 1.442695, %v538_v54  ;;  %v3107_v28 = vld [vmem:[#allocation5_spill] sm:$0xff] }
 0x2ae   :  { %v2432_v38 = vpop.eup %1792  ;;  %1818 = vpow2.f32 %v691_v11  ;;  %v3100_v11 = vld [vmem:[#allocation18_spill] sm:$0xff]  ;;  %v645_v37 = vmul.f32 1.442695, %v541_v8 }
 0x2af   :  { %v1795_v40 = vpop.eup %1794  ;;  %1820 = vpow2.f32 %v679_v21  ;;  %732 = vmatpush1.bf16.msra.mxu1 %v701_v42  ;;  %v715_v3 = vpack.c.bf16 %v2432_v38, %v2424_v62  ;;  %v534_v48 = vsub.f32 %v3100_v11, %v2314_v23  ;;  %v537_v21 = vsub.f32 %v3101_v36, %v2302_v29 }
 0x2b0   :  { %v2436_v51 = vpop.eup %1796  ;;  %1822 = vpow2.f32 %v687_v57  ;;  %733 = vmatprep.subr.bf16.mxu1 %v700_v12  ;;  %v698_v41 = vpack.c.bf16 %v1795_v40, %v1791_v39  ;;  %v3102_v39 = vld [vmem:[#allocation22_spill] sm:$0xff]  ;;  %v3103_v12 = vld [vmem:[#allocation20_spill] sm:$0xff] }
 0x2b1   :  { %v2438_v56 = vpop.eup %1798  ;;  %1824 = vpow2.f32 %v685_v4  ;;  %v539_v47 = vsub.f32 %v3102_v39, %v2302_v29  ;;  %v649_v4 = vmul.f32 1.442695, %v543_v13  ;;  %v536_v40 = vsub.f32 %v3103_v12, %v2314_v23  ;;  %v1997_v12 = vld [vmem:[%s3006_s1 + $0x8] sm:$0xff] }
 0x2b2   :  { %v2442_v14 = vpop.eup %1800  ;;  %1826 = vpow2.f32 %v683_v49  ;;  %v637_v53 = vmul.f32 1.442695, %v537_v21  ;;  %v1702_v21 = vld [vmem:[%s3005_s0 + $0x8] sm:$0xff] }
 0x2b3   :  { %v2444_v59 = vpop.eup %1802  ;;  %734 = vmatpush1.bf16.msra.mxu1 %v699_v7  ;;  %v717_v16 = vpack.c.bf16 %v2442_v14, %v2436_v51  ;;  %1828 = vpow2.f32 %v677_v20  ;;  %v643_v20 = vmul.f32 1.442695, %v540_v52  ;;  %v631_v7 = vmul.f32 1.442695, %v534_v48 }
 0x2b4   :  { %v2448_v44 = vpop.eup %1804  ;;  %735 = vmatprep.subr.bf16.mxu1 %v698_v41  ;;  %v718_v61 = vpack.c.bf16 %v2444_v59, %v2438_v56  ;;  %1830 = vpow2.f32 %v681_v15  ;;  %v3104_v41 = vld [vmem:[#allocation17_spill] sm:$0xff] }
 0x2b5   :  { %v2452_v17 = vpop.eup %1806  ;;  %1832 = vpow2.f32 %v655_v58 }
 0x2b6   :  { %v2458_v18 = vpop.eup %1808  ;;  %1834 = vpow2.f32 %v659_v9 }
 0x2b7   :  { %v2463_v50 = vpop.eup %1810  ;;  %736 = vmatpush1.bf16.msra.mxu1 %v697_v25  ;;  %v719_v46 = vpack.c.bf16 %v2458_v18, %v2448_v44  ;;  %1836 = vpow2.f32 %v647_v60  ;;  %v3105_v25 = vld [vmem:[#allocation19_spill] sm:$0xff] }
 0x2b8   :  { %v1813_v6 = vpop.eup %1812  ;;  %737 = vmatprep.subr.bf16.mxu1 %v696_v31  ;;  %v720_v32 = vpack.c.bf16 %v2463_v50, %v2452_v17  ;;  %1838 = vpow2.f32 %v651_v5  ;;  %v533_v17 = vsub.f32 %v3104_v41, %v2302_v29  ;;  %v535_v1 = vsub.f32 %v3105_v25, %v2302_v29  ;;  %v1999_v41 = vld [vmem:[%s3005_s0] sm:$0xff] }
 0x2b9   :  { %v1815_v19 = vpop.eup %1814  ;;  %1840 = vpow2.f32 %v639_v0  ;;  %v641_v31 = vmul.f32 1.442695, %v539_v47  ;;  %v2519_v47 = vcombine.high %v1702_v21, %v1702_v21 }
 0x2ba   :  { %v1817_v43 = vpop.eup %1816  ;;  %1842 = vpow2.f32 %v645_v37  ;;  %v629_v23 = vmul.f32 1.442695, %v533_v17 }
 0x2bb   :  { %v1819_v33 = vpop.eup %1818  ;;  %738 = vmatpush1.bf16.msra.mxu1 %v695_v34  ;;  %v693_v30 = vpack.c.bf16 %v1817_v43, %v1815_v19  ;;  %1844 = vpow2.f32 %v649_v4  ;;  %v633_v19 = vmul.f32 1.442695, %v535_v1  ;;  %3110 = vst [vmem:[#allocation12_spill] sm:$0xff] %v2519_v47 }
 0x2bc   :  { %v1821_v22 = vpop.eup %1820  ;;  %739 = vmatprep.subr.bf16.mxu1 %v694_v45  ;;  %1846 = vpow2.f32 %v643_v20  ;;  %v3111_v20 = vmov 0  }
 0x2bd   :  { %v1823_v63 = vpop.eup %1822  ;;  %1848 = vpow2.f32 %v631_v7 }
 0x2be   :  { %v1825_v10 = vpop.eup %1824  ;;  %v724_v24 = vpack.c.bf16 %v1819_v33, %v1823_v63  ;;  %1850 = vpow2.f32 %v637_v53  ;;  %v3112_v53 = vld [vmem:[#allocation2_spill] sm:$0xff] }
 0x2bf   :  { %v1827_v35 = vpop.eup %1826  ;;  %740 = vmatpush1.bf16.msra.mxu1 %v693_v30  ;;  %v723_v42 = vpack.c.bf16 %v1813_v6, %v1825_v10  ;;  %v635_v6 = vmul.f32 1.442695, %v536_v40  ;;  %1852 = vpow2.f32 %v641_v31  ;;  %v774_v30 = vlaneseq  ;;  %v1998_v40 = vld [vmem:[%s3006_s1 + $0x10] sm:$0xff] }
 0x2c0   :  { %741 = vmatprep.subr.bf16.mxu1 %v724_v24  ;;  %v1829_v57 = vpop.eup %1828  ;;  %v722_v15 = vpack.c.bf16 %v1827_v35, %v1821_v22  ;;  %v3106_v22 = vld [vmem:[#allocation6_spill] sm:$0xff] }
 0x2c1   :  { %v1831_v49 = vpop.eup %1830  ;;  %1854 = vpow2.f32 %v635_v6  ;;  %v137_v8 = vadd.f32 %v3107_v28, %v3106_v22  ;;  %v775_v26 = vshrl.u32 %v774_v30, 7 }
 0x2c2   :  { %v721_v50 = vpack.c.bf16 %v1831_v49, %v1829_v57  ;;  %v1833_v2 = vpop.eup %1832  ;;  %1856 = vpow2.f32 %v629_v23  ;;  %v1996_v49 = vld [vmem:[%s3006_s1] sm:$0xff] }
 0x2c3   :  { %742 = vmatpush2.bf16.msra.mxu1 %v723_v42  ;;  %v1835_v58 = vpop.eup %1834  ;;  %1858 = vpow2.f32 %v633_v19  ;;  %v145_v38 = vpack.c.bf16 %v137_v8, %v137_v8  ;;  %v2512_v11 = vsub.s32 7, %v775_v26  ;;  %v21_v42 = vld [vmem:[%s3008_s3] sm:$0xf] }
 0x2c4   :  { %743 = vmatprep.subr.bf16.mxu1 %v722_v15  ;;  %v1837_v29 = vpop.eup %1836  ;;  %v716_v34 = vpack.c.bf16 %v1835_v58, %v1833_v2 }
 0x2c5   :  { %v1839_v43 = vpop.eup %1838  ;;  %3109 = vst [vmem:[#allocation10_spill] sm:$0xff] %v2512_v11 }
 0x2c6   :  { %v714_v45 = vpack.c.bf16 %v1839_v43, %v1837_v29 }
 0x2c7   :  { %744 = vmatpush2.bf16.msra.mxu1 %v721_v50  ;;  %v3113_v50 = vld [vmem:[#allocation4_spill] sm:$0xff] }
 0x2c8   :  { %745 = vmatprep.subr.bf16.mxu1 %v720_v32  ;;  %v1841_v32 = vpop.eup %1840 }
 0x2c9   :  { %v1843_v55 = vpop.eup %1842 }
 0x2ca   :  { %v1845_v9 = vpop.eup %1844 }
 0x2cb   :  { %746 = vmatpush2.bf16.msra.mxu1 %v719_v46  ;;  %v1847_v44 = vpop.eup %1846 }
 0x2cc   :  { %747 = vmatprep.subr.bf16.mxu1 %v718_v61  ;;  %v1849_v56 = vpop.eup %1848  ;;  %v713_v61 = vpack.c.bf16 %v1845_v9, %v1843_v55  ;;  %v712_v46 = vpack.c.bf16 %v1847_v44, %v1841_v32 }
 0x2cd   :  { %v1851_v59 = vpop.eup %1850 }
 0x2ce   :  { %v1853_v18 = vpop.eup %1852 }
 0x2cf   :  { %748 = vmatpush2.bf16.msra.mxu1 %v717_v16  ;;  %v1855_v33 = vpop.eup %1854  ;;  %v711_v14 = vpack.c.bf16 %v1853_v18, %v1851_v59 }
 0x2d0   :  { %749 = vmatprep.subr.bf16.mxu1 %v716_v34  ;;  %v1857_v51 = vpop.eup %1856  ;;  %v710_v54 = vpack.c.bf16 %v1855_v33, %v1849_v56  ;;  %v3114_v34 = vld [vmem:[#allocation3_spill] sm:$0xff] }
 0x2d1   :  { %v1859_v16 = vpop.eup %1858 }
 0x2d2   :  { %v709_v62 = vpack.c.bf16 %v1859_v16, %v1857_v51 }
 0x2d3   :  { %750 = vmatpush2.bf16.msra.mxu1 %v715_v3  ;;  %v3108_v3 = vmov 0.0  }
 0x2d4   :  { %751 = vmatprep.subr.bf16.mxu1 %v714_v45 }
 0x2d7   :  { %752 = vmatpush2.bf16.msra.mxu1 %v713_v61 }
 0x2d8   :  { %753 = vmatprep.subr.bf16.mxu1 %v712_v46 }
 0x2db   :  { %754 = vmatpush2.bf16.msra.mxu1 %v711_v14 }
 0x2dc   :  { %755 = vmatprep.subr.bf16.mxu1 %v710_v54 }
 0x2df   :  { %756 = vmatpush2.bf16.msra.mxu1 %v709_v62 }
 0x2e2   :  { %758 = vmatmul.mubr.bf16.vlgmr.msra.gmra.mxu1 %v145_v38 }
 0x2e3   :  { %1662 = vmatprep.mubr.f32.mxu1 %v3108_v3 }
 0x3a2   :  { %v759_v63 = vpop.f32.mrf.mxu1 }
 0x3a3   :  { %1860 = vrcp.f32 %v759_v63 }
 0x3a4   :  { %v761_v27 = vpop.f32.mrf.mxu1 }
 0x3a5   :  { %1862 = vrcp.f32 %v761_v27 }
 0x3a6   :  { %v763_v13 = vpop.f32.mrf.mxu1 }
 0x3a8   :  { %v764_v60 = vpop.f32.mrf.mxu1 }
 0x3b0   :  { %v1861_v10 = vpop.eup %1860 }
 0x3b1   :  { %v768_v52 = vmul.f32 %v1861_v10, %v759_v63 }
 0x3b2   :  { %v1863_v5 = vpop.eup %1862 }
 0x3b3   :  { %v770_v24 = vsub.f32 2.0, %v768_v52  ;;  %v769_v35 = vmul.f32 %v1863_v5, %v761_v27 }
 0x3b5   :  { %v771_v48 = vsub.f32 2.0, %v769_v35  ;;  %v772_v0 = vmul.f32 %v1861_v10, %v770_v24 }
 0x3b7   :  { %v773_v36 = vmul.f32 %v1863_v5, %v771_v48  ;;  %v777_v37 = vrot.slane %v772_v0, %v2512_v11 }
 0x3b9   :  { %v781_v57 = vrot.slane %v773_v36, %v2512_v11  ;;  %v782_v4 = vmul.f32 %v777_v37, %v759_v63 }
 0x3bb   :  { %v783_v39 = vmul.f32 %v781_v57, %v761_v27 }
 0x3bd   :  { %818 = vmatprep.subr.mxu0 %v783_v39 }
 0x3be   :  { %819 = vmatpush1.msra.mxu0 %v782_v4 }
 0x3bf   :  { %1701 = vmatmul.mubr.msk.f32.vlgmr.msra.gmra.mxu0 %vm179_vm2, %v21_v42  ;;  %1703 = vmatprep.subr.msk.mxu0 %vm53_vm0, %v2519_v47 }
 0x3c0   :  { %1704 = vmatpush1.msk.msra.mxu0 %vm53_vm0, %v1702_v21  ;;  %936 = vmatprep.mubr.f32.mxu0 %v3108_v3 }
 0x3c3   :  { %1705 = vmatmul.mubr.msk.f32.vlgmr.msra.gmra.mxu0 %vm43_vm1, %v1996_v49 }
 0x3c4   :  { %942 = vmatprep.mubr.f32.mxu0 %v3108_v3 }
 0x3c7   :  { %1706 = vmatmul.mubr.msk.f32.gmra.mxu0 %vm43_vm1, %v1997_v12 }
 0x3c8   :  { %948 = vmatprep.mubr.f32.mxu0 %v3108_v3 }
 0x3cb   :  { %1707 = vmatmul.mubr.msk.f32.gmra.mxu0 %vm43_vm1, %v1998_v40 }
 0x3cc   :  { %1079 = vmatprep.mubr.bf16.mxu0 %v3111_v20 }
 0x47f   :  { %v854_v15 = vpop.f32.mrf.mxu0 }
 0x480   :  { %v855_v17 = vadd.f32 %v1999_v41, %v854_v15 }
 0x481   :  { %v856_v7 = vpop.f32.mrf.mxu0 }
 0x482   :  { %v857_v25 = vadd.f32 %v856_v7, %v3112_v53 }
 0x483   :  { %v938_v1 = vpop.f32.mrf.mxu0 }
 0x484   :  { %v861_v31 = vcombine.low %v855_v17, %v857_v25  ;;  %v939_v6 = vadd.f32 %v938_v1, %v3113_v50 }
 0x485   :  { %v940_v23 = vpop.f32.mrf.mxu0 }
 0x486   :  { %863 = vst [vmem:[%s3009_s4] sm:$0xff] %v861_v31  ;;  %v955_v19 = vpack.c.bf16 %v939_v6, %v939_v6  ;;  %v941_v2 = vadd.f32 %v940_v23, %v3113_v50 }
 0x487   :  { %v944_v58 = vpop.f32.mrf.mxu0 }
 0x488   :  { %v956_v29 = vpack.c.bf16 %v941_v2, %v941_v2  ;;  %v945_v43 = vadd.f32 %v944_v58, %v3114_v34  ;;  %v1042_v55 = vsel %vm53_vm0, %v955_v19, 0 }
 0x489   :  { %v946_v32 = vpop.f32.mrf.mxu0 }
 0x48a   :  { %v957_v9 = vpack.c.bf16 %v945_v43, %v945_v43  ;;  %v947_v45 = vadd.f32 %v946_v32, %v3114_v34  ;;  %1708 = vmatprep.subr.msk.bf16.mxu0 %vm53_vm0, %v956_v29 }
 0x48b   :  { %1062 = vmatpush1.bf16.msra.mxu0 %v1042_v55  ;;  %v2585_v3 = vpop.f32.mrf.mxu0 }
 0x48c   :  { %v958_v44 = vpack.c.bf16 %v947_v45, %v947_v45  ;;  %961 = vxpose.xlu0.c.b16.start.end [1/1] (short) %v957_v9, 128  ;;  %3115 = vst [vmem:[#allocation14_spill] sm:$0xff] %v2585_v3 }
 0x48d   :  { %v952_v27 = vpop.f32.mrf.mxu0 }
 0x48e   :  { %977 = vxpose.xlu1.c.b16.start.end [1/1] (short) %v958_v44, 128  ;;  %v953_v13 = vadd.f32 %v952_v27, %v3106_v22 }
 0x490   :  { %v960_v30 = vpack.c.bf16 %v953_v13, %v953_v13 }
 0x4ee   :  { %v969_v56 = vpop.trf.xlu0 }
 0x4ef   :  { %1709 = vmatmul.mubr.msk.bf16.vlgmr.msra.gmra.mxu0 %vm179_vm2, %v969_v56 }
 0x4f0   :  { %1089 = vmatprep.mubr.bf16.mxu0 %v3111_v20  ;;  %v985_v16 = vpop.trf.xlu1 }
 0x4f2   :  { %v970_v59 = vpop.trf.xlu0 }
 0x4f4   :  { %v986_v54 = vpop.trf.xlu1 }
 0x4f6   :  { %v971_v61 = vpop.trf.xlu0 }
 0x4f7   :  { %1710 = vmatmul.mubr.msk.bf16.gmra.mxu0 %vm179_vm2, %v970_v59 }
 0x4f8   :  { %1099 = vmatprep.mubr.bf16.mxu0 %v3111_v20  ;;  %v987_v28 = vpop.trf.xlu1 }
 0x4fa   :  { %v972_v18 = vpop.trf.xlu0 }
 0x4fc   :  { %v988_v8 = vpop.trf.xlu1 }
 0x4fe   :  { %v973_v46 = vpop.trf.xlu0 }
 0x4ff   :  { %1711 = vmatmul.mubr.msk.bf16.gmra.mxu0 %vm179_vm2, %v971_v61 }
 0x500   :  { %1109 = vmatprep.mubr.bf16.mxu0 %v3111_v20  ;;  %v989_v62 = vpop.trf.xlu1 }
 0x502   :  { %v974_v33 = vpop.trf.xlu0 }
 0x504   :  { %v990_v38 = vpop.trf.xlu1 }
 0x506   :  { %v975_v51 = vpop.trf.xlu0 }
 0x507   :  { %1712 = vmatmul.mubr.msk.bf16.gmra.mxu0 %vm179_vm2, %v972_v18 }
 0x508   :  { %1119 = vmatprep.mubr.bf16.mxu0 %v3111_v20  ;;  %v991_v63 = vpop.trf.xlu1 }
 0x50a   :  { %v976_v14 = vpop.trf.xlu0 }
 0x50c   :  { %v992_v60 = vpop.trf.xlu1 }
 0x50f   :  { %1713 = vmatmul.mubr.msk.bf16.gmra.mxu0 %vm179_vm2, %v973_v46 }
 0x510   :  { %1129 = vmatprep.mubr.bf16.mxu0 %v3111_v20 }
 0x517   :  { %1714 = vmatmul.mubr.msk.bf16.gmra.mxu0 %vm179_vm2, %v974_v33 }
 0x518   :  { %1139 = vmatprep.mubr.bf16.mxu0 %v3111_v20 }
 0x51f   :  { %1715 = vmatmul.mubr.msk.bf16.gmra.mxu0 %vm179_vm2, %v975_v51 }
 0x520   :  { %1149 = vmatprep.mubr.bf16.mxu0 %v3111_v20 }
 0x527   :  { %1716 = vmatmul.mubr.msk.bf16.gmra.mxu0 %vm179_vm2, %v976_v14 }
 0x528   :  { %1159 = vmatprep.mubr.bf16.mxu0 %v3111_v20 }
 0x52f   :  { %1717 = vmatmul.mubr.msk.bf16.gmra.mxu0 %vm179_vm2, %v985_v16 }
 0x530   :  { %1169 = vmatprep.mubr.bf16.mxu0 %v3111_v20 }
 0x537   :  { %1718 = vmatmul.mubr.msk.bf16.gmra.mxu0 %vm179_vm2, %v986_v54 }
 0x538   :  { %1179 = vmatprep.mubr.bf16.mxu0 %v3111_v20 }
 0x53f   :  { %1719 = vmatmul.mubr.msk.bf16.gmra.mxu0 %vm179_vm2, %v987_v28 }
 0x540   :  { %1189 = vmatprep.mubr.bf16.mxu0 %v3111_v20 }
 0x547   :  { %1720 = vmatmul.mubr.msk.bf16.gmra.mxu0 %vm179_vm2, %v988_v8 }
 0x548   :  { %1199 = vmatprep.mubr.bf16.mxu0 %v3111_v20 }
 0x54f   :  { %1721 = vmatmul.mubr.msk.bf16.gmra.mxu0 %vm179_vm2, %v989_v62 }
 0x550   :  { %1209 = vmatprep.mubr.bf16.mxu0 %v3111_v20 }
 0x557   :  { %1722 = vmatmul.mubr.msk.bf16.gmra.mxu0 %vm179_vm2, %v990_v38 }
 0x558   :  { %1219 = vmatprep.mubr.bf16.mxu0 %v3111_v20 }
 0x55f   :  { %1723 = vmatmul.mubr.msk.bf16.gmra.mxu0 %vm179_vm2, %v991_v63 }
 0x560   :  { %1229 = vmatprep.mubr.bf16.mxu0 %v3111_v20 }
 0x567   :  { %1724 = vmatmul.mubr.msk.bf16.gmra.mxu0 %vm179_vm2, %v992_v60 }
 0x568   :  { %1570 = vmatprep.mubr.bf16.mxu0 %v960_v30 }
 0x5af   :  { %v2591_v10 = vpop.f32.mrf.mxu0 }
 0x5b0   :  { %3116 = vst [vmem:[#allocation15_spill] sm:$0xff] %v2591_v10 }
 0x5b1   :  { %v2593_v26 = vpop.f32.mrf.mxu0 }
 0x5b3   :  { %v2595_v52 = vpop.f32.mrf.mxu0 }
 0x5b4   :  { %3117 = vst [vmem:[#allocation16_spill] sm:$0xff] %v2595_v52 }
 0x5b5   :  { %v2597_v5 = vpop.f32.mrf.mxu0 }
 0x5b7   :  { %v2599_v24 = vpop.f32.mrf.mxu0 }
 0x5b8   :  { %v1240_v27 = vmax.f32 %v2591_v10, %v2599_v24 }
 0x5b9   :  { %v2601_v35 = vpop.f32.mrf.mxu0 }
 0x5ba   :  { %3118 = vst [vmem:[#allocation9_spill] sm:$0xff] %v2601_v35 }
 0x5bb   :  { %v2603_v48 = vpop.f32.mrf.mxu0 }
 0x5bc   :  { %3119 = vst [vmem:[#allocation11_spill] sm:$0xff] %v2603_v48  ;;  %v1241_v38 = vmax.f32 %v2595_v52, %v2603_v48 }
 0x5bd   :  { %v2605_v0 = vpop.f32.mrf.mxu0 }
 0x5be   :  { %3120 = vst [vmem:[#allocation13_spill] sm:$0xff] %v2605_v0  ;;  %v1278_v48 = vmax.f32 %v2597_v5, %v2605_v0 }
 0x5bf   :  { %v2607_v36 = vpop.f32.mrf.mxu0 }
 0x5c0   :  { %v1242_v30 = vmax.f32 %v1240_v27, %v2607_v36  ;;  %v1277_v27 = vmax.f32 %v2593_v26, %v2601_v35 }
 0x5c1   :  { %v2609_v21 = vpop.f32.mrf.mxu0 }
 0x5c3   :  { %v2611_v37 = vpop.f32.mrf.mxu0 }
 0x5c4   :  { %3121 = vst [vmem:[#allocation7_spill] sm:$0xff] %v2611_v37  ;;  %v1243_v13 = vmax.f32 %v1241_v38, %v2611_v37 }
 0x5c5   :  { %v2613_v57 = vpop.f32.mrf.mxu0 }
 0x5c6   :  { %3122 = vst [vmem:[#allocation8_spill] sm:$0xff] %v2613_v57 }
 0x5c7   :  { %v2615_v39 = vpop.f32.mrf.mxu0 }
 0x5c8   :  { %v1244_v3 = vmax.f32 %v1242_v30, %v2615_v39 }
 0x5c9   :  { %v2617_v4 = vpop.f32.mrf.mxu0 }
 0x5cb   :  { %v2619_v42 = vpop.f32.mrf.mxu0 }
 0x5cc   :  { %3123 = vst [vmem:[#allocation24_spill] sm:$0xff] %v2619_v42  ;;  %v1245_v47 = vmax.f32 %v1243_v13, %v2619_v42  ;;  %v1280_v13 = vmax.f32 %v1278_v48, %v2613_v57 }
 0x5cd   :  { %v2621_v49 = vpop.f32.mrf.mxu0 }
 0x5ce   :  { %v1282_v42 = vmax.f32 %v1280_v13, %v2621_v49 }
 0x5cf   :  { %v2623_v12 = vpop.f32.mrf.mxu0 }
 0x5d0   :  { %v1246_v10 = vmax.f32 %v1244_v3, %v2623_v12 }
 0x5d1   :  { %v2625_v40 = vpop.f32.mrf.mxu0 }
 0x5d3   :  { %v2627_v20 = vpop.f32.mrf.mxu0 }
 0x5d4   :  { %3124 = vst [vmem:[#allocation25_spill] sm:$0xff] %v2627_v20  ;;  %v1247_v22 = vmax.f32 %v1245_v47, %v2627_v20  ;;  %v1279_v20 = vmax.f32 %v1277_v27, %v2609_v21 }
 0x5d5   :  { %v2629_v15 = vpop.f32.mrf.mxu0 }
 0x5d6   :  { %v1284_v35 = vmax.f32 %v1282_v42, %v2629_v15 }
 0x5d7   :  { %v2631_v7 = vpop.f32.mrf.mxu0 }
 0x5d8   :  { %v1248_v30 = vmax.f32 %v1246_v10, %v2631_v7 }
 0x5d9   :  { %v2633_v41 = vpop.f32.mrf.mxu0 }
 0x5db   :  { %v2635_v17 = vpop.f32.mrf.mxu0 }
 0x5dc   :  { %3125 = vst [vmem:[#allocation23_spill] sm:$0xff] %v2635_v17  ;;  %v1249_v38 = vmax.f32 %v1247_v22, %v2635_v17  ;;  %v1281_v17 = vmax.f32 %v1279_v20, %v2617_v4 }
 0x5dd   :  { %v2637_v53 = vpop.f32.mrf.mxu0 }
 0x5de   :  { %v1286_v27 = vmax.f32 %v1284_v35, %v2637_v53 }
 0x5df   :  { %v2639_v25 = vpop.f32.mrf.mxu0 }
 0x5e0   :  { %v1250_v0 = vmax.f32 %v1248_v30, %v2639_v25 }
 0x5e1   :  { %v2641_v1 = vpop.f32.mrf.mxu0 }
 0x5e3   :  { %v2643_v31 = vpop.f32.mrf.mxu0 }
 0x5e4   :  { %v1251_v47 = vmax.f32 %v1249_v38, %v2643_v31  ;;  %v1283_v38 = vmax.f32 %v1281_v17, %v2625_v40 }
 0x5e5   :  { %v2645_v50 = vpop.f32.mrf.mxu0 }
 0x5e6   :  { %v1288_v20 = vmax.f32 %v1286_v27, %v2645_v50 }
 0x5e7   :  { %v2647_v6 = vpop.f32.mrf.mxu0 }
 0x5e8   :  { %v1252_v48 = vmax.f32 %v1250_v0, %v2647_v6 }
 0x5e9   :  { %v2649_v23 = vpop.f32.mrf.mxu0 }
 0x5eb   :  { %v2651_v19 = vpop.f32.mrf.mxu0 }
 0x5ec   :  { %v1253_v3 = vmax.f32 %v1251_v47, %v2651_v19  ;;  %v1285_v47 = vmax.f32 %v1283_v38, %v2633_v41 }
 0x5ed   :  { %v2653_v2 = vpop.f32.mrf.mxu0 }
 0x5ee   :  { %v1290_v17 = vmax.f32 %v1288_v20, %v2653_v2 }
 0x5ef   :  { %v2655_v58 = vpop.f32.mrf.mxu0 }
 0x5f0   :  { %3126 = vst [vmem:[#allocation18_spill] sm:$0xff] %v2655_v58  ;;  %v1254_v13 = vmax.f32 %v1252_v48, %v2655_v58 }
 0x5f1   :  { %v2657_v29 = vpop.f32.mrf.mxu0 }
 0x5f2   :  { %3127 = vst [vmem:[#allocation21_spill] sm:$0xff] %v2657_v29 }
 0x5f3   :  { %v2659_v34 = vpop.f32.mrf.mxu0 }
 0x5f4   :  { %3128 = vst [vmem:[#allocation22_spill] sm:$0xff] %v2659_v34  ;;  %v1255_v10 = vmax.f32 %v1253_v3, %v2659_v34  ;;  %v1287_v3 = vmax.f32 %v1285_v47, %v2641_v1 }
 0x5f5   :  { %v2661_v43 = vpop.f32.mrf.mxu0 }
 0x5f6   :  { %3129 = vst [vmem:[#allocation20_spill] sm:$0xff] %v2661_v43  ;;  %v1292_v38 = vmax.f32 %v1290_v17, %v2661_v43 }
 0x5f7   :  { %v2663_v32 = vpop.f32.mrf.mxu0 }
 0x5f8   :  { %3130 = vst [vmem:[#allocation17_spill] sm:$0xff] %v2663_v32  ;;  %v1256_v42 = vmax.f32 %v1254_v13, %v2663_v32 }
 0x5f9   :  { %v2665_v55 = vpop.f32.mrf.mxu0 }
 0x5fb   :  { %v2667_v9 = vpop.f32.mrf.mxu0 }
 0x5fc   :  { %3131 = vst [vmem:[#allocation19_spill] sm:$0xff] %v2667_v9  ;;  %v1257_v30 = vmax.f32 %v1255_v10, %v2667_v9  ;;  %v1289_v10 = vmax.f32 %v1287_v3, %v2649_v23 }
 0x5fd   :  { %v2669_v45 = vpop.f32.mrf.mxu0 }
 0x5fe   :  { %3132 = vst [vmem:[#allocation5_spill] sm:$0xff] %v2669_v45  ;;  %v1294_v47 = vmax.f32 %v1292_v38, %v2669_v45 }
 0x5ff   :  { %v2671_v44 = vpop.f32.mrf.mxu0 }
 0x600   :  { %3133 = vst [vmem:[#allocation2_spill] sm:$0xff] %v2671_v44  ;;  %v1258_v35 = vmax.f32 %v1256_v42, %v2671_v44  ;;  %v3135_v44 = vld [vmem:[#allocation11_spill] sm:$0xff] }
 0x601   :  { %v2673_v56 = vpop.f32.mrf.mxu0 }
 0x603   :  { %v2675_v59 = vpop.f32.mrf.mxu0 }
 0x604   :  { %3134 = vst [vmem:[#allocation4_spill] sm:$0xff] %v2675_v59  ;;  %v1259_v0 = vmax.f32 %v1257_v30, %v2675_v59  ;;  %v1291_v30 = vmax.f32 %v1289_v10, %v2657_v29 }
 0x605   :  { %v2677_v61 = vpop.f32.mrf.mxu0 }
 0x606   :  { %v1296_v3 = vmax.f32 %v1294_v47, %v2677_v61 }
 0x607   :  { %v2679_v18 = vpop.f32.mrf.mxu0 }
 0x608   :  { %v1260_v27 = vmax.f32 %v1258_v35, %v2679_v18 }
 0x609   :  { %v2681_v46 = vpop.f32.mrf.mxu0 }
 0x60b   :  { %v2683_v33 = vpop.f32.mrf.mxu0 }
 0x60c   :  { %v1261_v48 = vmax.f32 %v1259_v0, %v2683_v33  ;;  %v1293_v0 = vmax.f32 %v1291_v30, %v2665_v55 }
 0x60d   :  { %v2685_v51 = vpop.f32.mrf.mxu0 }
 0x60e   :  { %v1298_v10 = vmax.f32 %v1296_v3, %v2685_v51 }
 0x60f   :  { %v2687_v14 = vpop.f32.mrf.mxu0 }
 0x610   :  { %v1262_v20 = vmax.f32 %v1260_v27, %v2687_v14 }
 0x611   :  { %v2689_v16 = vpop.f32.mrf.mxu0 }
 0x613   :  { %v2691_v54 = vpop.f32.mrf.mxu0 }
 0x614   :  { %v1263_v13 = vmax.f32 %v1261_v48, %v2691_v54  ;;  %v1295_v48 = vmax.f32 %v1293_v0, %v2673_v56 }
 0x615   :  { %v2693_v28 = vpop.f32.mrf.mxu0 }
 0x616   :  { %v1300_v43 = vmax.f32 %v1298_v10, %v2693_v28 }
 0x617   :  { %v2695_v8 = vpop.f32.mrf.mxu0 }
 0x618   :  { %v1264_v17 = vmax.f32 %v1262_v20, %v2695_v8 }
 0x619   :  { %v2697_v62 = vpop.f32.mrf.mxu0 }
 0x61b   :  { %v2701_v63 = vpop.f32.mrf.mxu0 }
 0x61c   :  { %v1265_v42 = vmax.f32 %v1263_v13, %v2701_v63  ;;  %v1297_v13 = vmax.f32 %v1295_v48, %v2681_v46 }
 0x61d   :  { %v2706_v60 = vpop.f32.mrf.mxu0 }
 0x61e   :  { %v1299_v47 = vmax.f32 %v1297_v13, %v2689_v16  ;;  %v1302_v20 = vmax.f32 %v1300_v43, %v2706_v60 }
 0x61f   :  { %v2710_v11 = vpop.f32.mrf.mxu0 }
 0x620   :  { %v1266_v38 = vmax.f32 %v1264_v17, %v2710_v11  ;;  %v1301_v0 = vmax.f32 %v1299_v47, %v2697_v62 }
 0x621   :  { %v2714_v52 = vpop.f32.mrf.mxu0 }
 0x622   :  { %v1303_v17 = vmax.f32 %v1301_v0, %v2714_v52 }
 0x623   :  { %v2720_v37 = vpop.f32.mrf.mxu0 }
 0x624   :  { %v1267_v35 = vmax.f32 %v1265_v42, %v2720_v37 }
 0x625   :  { %v2731_v22 = vpop.f32.mrf.mxu0 }
 0x626   :  { %v1304_v3 = vmax.f32 %v1302_v20, %v2731_v22 }
 0x627   :  { %v2741_v57 = vpop.f32.mrf.mxu0 }
 0x628   :  { %v1268_v30 = vmax.f32 %v1266_v38, %v2741_v57 }
 0x629   :  { %v2751_v34 = vpop.f32.mrf.mxu0 }
 0x62a   :  { %v1305_v10 = vmax.f32 %v1303_v17, %v2751_v34  ;;  %v3136_v17 = vld [vmem:[#allocation7_spill] sm:$0xff] }
 0x62b   :  { %v2761_v58 = vpop.f32.mrf.mxu0 }
 0x62c   :  { %v1269_v27 = vmax.f32 %v1267_v35, %v2761_v58 }
 0x62d   :  { %v2776_v42 = vpop.f32.mrf.mxu0 }
 0x62e   :  { %v1270_v9 = vmax.f32 %v1268_v30, %v1269_v27  ;;  %v1306_v48 = vmax.f32 %v1304_v3, %v2776_v42 }
 0x630   :  { %v1271_v35 = vrot.slane %v1270_v9, 4  ;;  %v1307_v38 = vmax.f32 %v1305_v10, %v1306_v48  ;;  %v3137_v48 = vld [vmem:[#allocation24_spill] sm:$0xff] }
 0x632   :  { %v1272_v32 = vmax.f32 %v1270_v9, %v1271_v35  ;;  %v1308_v13 = vrot.slane %v1307_v38, 4 }
 0x634   :  { %v1273_v29 = vrot.slane %v1272_v32, 2  ;;  %v1309_v43 = vmax.f32 %v1307_v38, %v1308_v13  ;;  %v3138_v13 = vld [vmem:[#allocation25_spill] sm:$0xff] }
 0x636   :  { %v1274_v45 = vmax.f32 %v1272_v32, %v1273_v29  ;;  %v1310_v30 = vrot.slane %v1309_v43, 2 }
 0x638   :  { %v1275_v27 = vrot.slane %v1274_v45, 1  ;;  %v1311_v47 = vmax.f32 %v1309_v43, %v1310_v30 }
 0x63a   :  { %v2783_v59 = vmax.f32 %v1274_v45, %v1275_v27  ;;  %v1312_v0 = vrot.slane %v1311_v47, 1 }
 0x63c   :  { %v1318_v20 = vsub.f32 %v2599_v24, %v2783_v59  ;;  %v1320_v3 = vsub.f32 %v3135_v44, %v2783_v59  ;;  %v1322_v9 = vsub.f32 %v2607_v36, %v2783_v59  ;;  %v1324_v35 = vsub.f32 %v3136_v17, %v2783_v59 }
 0x63d   :  { %v1326_v29 = vsub.f32 %v2615_v39, %v2783_v59  ;;  %v2795_v32 = vmax.f32 %v1311_v47, %v1312_v0  ;;  %v1328_v10 = vsub.f32 %v3137_v48, %v2783_v59  ;;  %v1330_v38 = vsub.f32 %v2623_v12, %v2783_v59 }
 0x63e   :  { %v1386_v45 = vmul.f32 1.442695, %v1318_v20  ;;  %v1390_v24 = vmul.f32 1.442695, %v1320_v3  ;;  %v1394_v44 = vmul.f32 1.442695, %v1322_v9  ;;  %v1332_v36 = vsub.f32 %v3138_v13, %v2783_v59 }
 0x63f   :  { %v1398_v43 = vmul.f32 1.442695, %v1324_v35  ;;  %v1315_v27 = vsub.f32 %v2593_v26, %v2795_v32  ;;  %v1402_v30 = vmul.f32 1.442695, %v1326_v29  ;;  %v1317_v39 = vsub.f32 %v2597_v5, %v2795_v32 }
 0x640   :  { %1864 = vpow2.f32 %v1386_v45  ;;  %v1406_v47 = vmul.f32 1.442695, %v1328_v10  ;;  %v1339_v20 = vsub.f32 %v2641_v1, %v2795_v32  ;;  %v1410_v0 = vmul.f32 1.442695, %v1330_v38 }
 0x641   :  { %1866 = vpow2.f32 %v1390_v24  ;;  %v1341_v12 = vsub.f32 %v2645_v50, %v2795_v32  ;;  %v1414_v3 = vmul.f32 1.442695, %v1332_v36  ;;  %v1342_v26 = vsub.f32 %v2647_v6, %v2783_v59  ;;  %v3139_v36 = vld [vmem:[#allocation23_spill] sm:$0xff] }
 0x642   :  { %1868 = vpow2.f32 %v1394_v44  ;;  %v1380_v9 = vmul.f32 1.442695, %v1315_v27  ;;  %v1343_v5 = vsub.f32 %v2649_v23, %v2795_v32  ;;  %v1384_v17 = vmul.f32 1.442695, %v1317_v39 }
 0x643   :  { %1870 = vpow2.f32 %v1398_v43  ;;  %v1344_v1 = vsub.f32 %v2651_v19, %v2783_v59  ;;  %v1428_v35 = vmul.f32 1.442695, %v1339_v20  ;;  %v1345_v50 = vsub.f32 %v2653_v2, %v2795_v32 }
 0x644   :  { %1872 = vpow2.f32 %v1402_v30  ;;  %v1432_v29 = vmul.f32 1.442695, %v1341_v12  ;;  %v1335_v6 = vsub.f32 %v2633_v41, %v2795_v32  ;;  %v1434_v45 = vmul.f32 1.442695, %v1342_v26  ;;  %v3141_v12 = vld [vmem:[#allocation13_spill] sm:$0xff] }
 0x645   :  { %1874 = vpow2.f32 %v1406_v47  ;;  %v1338_v23 = vsub.f32 %v2639_v25, %v2783_v59  ;;  %v1436_v48 = vmul.f32 1.442695, %v1343_v5  ;;  %v1340_v19 = vsub.f32 %v2643_v31, %v2783_v59 }
 0x646   :  { %1876 = vpow2.f32 %v1410_v0  ;;  %v1438_v10 = vmul.f32 1.442695, %v1344_v1  ;;  %v1337_v2 = vsub.f32 %v2637_v53, %v2795_v32  ;;  %v1440_v24 = vmul.f32 1.442695, %v1345_v50 }
 0x647   :  { %1878 = vpow2.f32 %v1414_v3  ;;  %v1331_v41 = vsub.f32 %v2625_v40, %v2795_v32  ;;  %v1420_v38 = vmul.f32 1.442695, %v1335_v6  ;;  %v1334_v25 = vsub.f32 %v2631_v7, %v2783_v59  ;;  %v3140_v7 = vld [vmem:[#allocation9_spill] sm:$0xff] }
 0x648   :  { %1880 = vpow2.f32 %v1380_v9  ;;  %v1426_v13 = vmul.f32 1.442695, %v1338_v23  ;;  %v1336_v43 = vsub.f32 %v3139_v36, %v2783_v59  ;;  %v1430_v53 = vmul.f32 1.442695, %v1340_v19 }
 0x649   :  { %1882 = vpow2.f32 %v1384_v17  ;;  %v1333_v40 = vsub.f32 %v2629_v15, %v2795_v32  ;;  %v1424_v30 = vmul.f32 1.442695, %v1337_v2  ;;  %v1319_v47 = vsub.f32 %v3140_v7, %v2795_v32  ;;  %v3142_v2 = vld [vmem:[#allocation8_spill] sm:$0xff] }
 0x64a   :  { %1884 = vpow2.f32 %v1428_v35  ;;  %v1412_v20 = vmul.f32 1.442695, %v1331_v41  ;;  %v1321_v3 = vsub.f32 %v3141_v12, %v2795_v32  ;;  %v1418_v26 = vmul.f32 1.442695, %v1334_v25 }
 0x64b   :  { %1886 = vpow2.f32 %v1432_v29  ;;  %v1327_v15 = vsub.f32 %v2617_v4, %v2795_v32  ;;  %v1422_v5 = vmul.f32 1.442695, %v1336_v43  ;;  %v1329_v1 = vsub.f32 %v2621_v49, %v2795_v32 }
 0x64c   :  { %1888 = vpow2.f32 %v1434_v45  ;;  %v1416_v35 = vmul.f32 1.442695, %v1333_v40  ;;  %v1358_v29 = vsub.f32 %v2679_v18, %v2783_v59  ;;  %v1388_v6 = vmul.f32 1.442695, %v1319_v47 }
 0x64d   :  { %v2829_v44 = vpop.eup %1864  ;;  %1890 = vpow2.f32 %v1436_v48  ;;  %v1323_v4 = vsub.f32 %v2609_v21, %v2795_v32  ;;  %v1392_v23 = vmul.f32 1.442695, %v1321_v3  ;;  %v1360_v49 = vsub.f32 %v2683_v33, %v2783_v59 }
 0x64e   :  { %v2833_v31 = vpop.eup %1866  ;;  %1892 = vpow2.f32 %v1438_v10  ;;  %v1404_v19 = vmul.f32 1.442695, %v1327_v15  ;;  %v1325_v18 = vsub.f32 %v3142_v2, %v2795_v32  ;;  %v1466_v21 = vmul.f32 1.442695, %v1358_v29 }
 0x64f   :  { %v2837_v27 = vpop.eup %1868  ;;  %1894 = vpow2.f32 %v1440_v24  ;;  %v1408_v24 = vmul.f32 1.442695, %v1329_v1  ;;  %v1396_v33 = vmul.f32 1.442695, %v1323_v4  ;;  %v1364_v43 = vsub.f32 %v2691_v54, %v2783_v59 }
 0x650   :  { %v2841_v39 = vpop.eup %1870  ;;  %1896 = vpow2.f32 %v1420_v38  ;;  %v1362_v38 = vsub.f32 %v2687_v14, %v2783_v59  ;;  %v1400_v7 = vmul.f32 1.442695, %v1325_v18  ;;  %v1366_v47 = vsub.f32 %v2695_v8, %v2783_v59 }
 0x651   :  { %v2845_v0 = vpop.eup %1872  ;;  %1898 = vpow2.f32 %v1426_v13  ;;  %v1363_v13 = vsub.f32 %v2689_v16, %v2795_v32  ;;  %v1367_v12 = vsub.f32 %v2697_v62, %v2795_v32  ;;  %v1368_v15 = vsub.f32 %v2701_v63, %v2783_v59  ;;  %v3143_v63 = vld [vmem:[#allocation15_spill] sm:$0xff] }
 0x652   :  { %v2849_v9 = vpop.eup %1874  ;;  %1900 = vpow2.f32 %v1430_v53  ;;  %v1470_v53 = vmul.f32 1.442695, %v1360_v49  ;;  %v1369_v8 = vsub.f32 %v2706_v60, %v2795_v32  ;;  %v1376_v62 = vsub.f32 %v2761_v58, %v2783_v59  ;;  %v3144_v60 = vld [vmem:[#allocation16_spill] sm:$0xff] }
 0x653   :  { %v2853_v17 = vpop.eup %1876  ;;  %1902 = vpow2.f32 %v1424_v30  ;;  %v1365_v30 = vsub.f32 %v2693_v28, %v2795_v32  ;;  %v1476_v54 = vmul.f32 1.442695, %v1363_v13  ;;  %v1478_v28 = vmul.f32 1.442695, %v1364_v43 }
 0x654   :  { %v2857_v50 = vpop.eup %1878  ;;  %1904 = vpow2.f32 %v1412_v20  ;;  %v1474_v20 = vmul.f32 1.442695, %v1362_v38  ;;  %v1482_v4 = vmul.f32 1.442695, %v1366_v47  ;;  %v1314_v49 = vsub.f32 %v3143_v63, %v2783_v59 }
 0x655   :  { %v2861_v45 = vpop.eup %1880  ;;  %1906 = vpow2.f32 %v1418_v26  ;;  %v1316_v18 = vsub.f32 %v3144_v60, %v2783_v59  ;;  %v1377_v58 = vsub.f32 %v2776_v42, %v2795_v32  ;;  %v1488_v38 = vmul.f32 1.442695, %v1369_v8 }
 0x656   :  { %v2865_v48 = vpop.eup %1882  ;;  %1908 = vpow2.f32 %v1422_v5  ;;  %v1502_v13 = vmul.f32 1.442695, %v1376_v62  ;;  %v1375_v43 = vsub.f32 %v2751_v34, %v2795_v32  ;;  %v1374_v42 = vsub.f32 %v2741_v57, %v2783_v59 }
 0x657   :  { %v1885_v10 = vpop.eup %1884  ;;  %1910 = vpow2.f32 %v1416_v35  ;;  %v1480_v35 = vmul.f32 1.442695, %v1365_v30  ;;  %v1382_v30 = vmul.f32 1.442695, %v1316_v18  ;;  %v1504_v47 = vmul.f32 1.442695, %v1377_v58 }
 0x658   :  { %v1887_v41 = vpop.eup %1886  ;;  %1912 = vpow2.f32 %v1388_v6  ;;  %v1500_v57 = vmul.f32 1.442695, %v1375_v43  ;;  %v1361_v60 = vsub.f32 %v2685_v51, %v2795_v32  ;;  %v1508_v51 = vpack.c.bf16 %v2833_v31, %v2829_v44  ;;  %v3146_v44 = vld [vmem:[#allocation4_spill] sm:$0xff] }
 0x659   :  { %v1889_v25 = vpop.eup %1888  ;;  %1914 = vpow2.f32 %v1392_v23  ;;  %v1519_v29 = vpack.c.bf16 %v1887_v41, %v1885_v10  ;;  %v1356_v31 = vsub.f32 %v3146_v44, %v2783_v59 }
 0x65a   :  { %v1891_v36 = vpop.eup %1890  ;;  %1916 = vpow2.f32 %v1404_v19  ;;  %v1484_v19 = vmul.f32 1.442695, %v1367_v12 }
 0x65b   :  { %v1893_v40 = vpop.eup %1892  ;;  %1918 = vpow2.f32 %v1408_v24  ;;  %v1486_v24 = vmul.f32 1.442695, %v1368_v15  ;;  %v1498_v15 = vmul.f32 1.442695, %v1374_v42 }
 0x65c   :  { %v1895_v14 = vpop.eup %1894  ;;  %1920 = vpow2.f32 %v1466_v21  ;;  %v1520_v5 = vpack.c.bf16 %v1893_v40, %v1889_v25 }
 0x65d   :  { %v1897_v16 = vpop.eup %1896  ;;  %1922 = vpow2.f32 %v1396_v33  ;;  %v1521_v3 = vpack.c.bf16 %v1895_v14, %v1891_v36  ;;  %v1371_v33 = vsub.f32 %v2714_v52, %v2795_v32  ;;  %v1373_v52 = vsub.f32 %v2731_v22, %v2795_v32 }
 0x65e   :  { %v1899_v26 = vpop.eup %1898  ;;  %1924 = vpow2.f32 %v1470_v53  ;;  %v1378_v53 = vmul.f32 1.442695, %v1314_v49  ;;  %v1514_v22 = vpack.c.bf16 %v2857_v50, %v2853_v17  ;;  %v1512_v17 = vpack.c.bf16 %v2849_v9, %v2845_v0 }
 0x65f   :  { %v1901_v1 = vpop.eup %1900  ;;  %1926 = vpow2.f32 %v1400_v7  ;;  %1538 = vmatprep.subr.bf16.mxu0 %v1521_v3  ;;  %v1492_v34 = vmul.f32 1.442695, %v1371_v33  ;;  %v1359_v0 = vsub.f32 %v2681_v46, %v2795_v32  ;;  %v1510_v9 = vpack.c.bf16 %v2841_v39, %v2837_v27 }
 0x660   :  { %v1903_v6 = vpop.eup %1902  ;;  %1928 = vpow2.f32 %v1474_v20  ;;  %1539 = vmatpush1.bf16.msra.mxu0 %v1520_v5  ;;  %v1518_v10 = vpack.c.bf16 %v1901_v1, %v1899_v26  ;;  %v1372_v26 = vsub.f32 %v2720_v37, %v2783_v59  ;;  %v1496_v5 = vmul.f32 1.442695, %v1373_v52 }
 0x661   :  { %v1905_v23 = vpop.eup %1904  ;;  %1930 = vpow2.f32 %v1476_v54  ;;  %1540 = vmatprep.subr.bf16.mxu0 %v1519_v29  ;;  %v1517_v21 = vpack.c.bf16 %v1903_v6, %v1897_v16  ;;  %v1370_v54 = vsub.f32 %v2710_v11, %v2783_v59  ;;  %v1355_v27 = vsub.f32 %v2673_v56, %v2795_v32  ;;  %v3145_v56 = vld [vmem:[#allocation2_spill] sm:$0xff] }
 0x662   :  { %v1907_v2 = vpop.eup %1906  ;;  %1932 = vpow2.f32 %v1478_v28  ;;  %v1494_v6 = vmul.f32 1.442695, %v1372_v26  ;;  %v1468_v39 = vmul.f32 1.442695, %v1359_v0 }
 0x663   :  { %v1909_v41 = vpop.eup %1908  ;;  %1934 = vpow2.f32 %v1480_v35  ;;  %v1490_v29 = vmul.f32 1.442695, %v1370_v54  ;;  %v1460_v42 = vmul.f32 1.442695, %v1355_v27 }
 0x664   :  { %v1911_v25 = vpop.eup %1910  ;;  %1936 = vpow2.f32 %v1482_v4  ;;  %1541 = vmatpush1.bf16.msra.mxu0 %v1518_v10  ;;  %v1516_v7 = vpack.c.bf16 %v1909_v41, %v1907_v2 }
 0x665   :  { %v2897_v36 = vpop.eup %1912  ;;  %1938 = vpow2.f32 %v1484_v19  ;;  %1542 = vmatprep.subr.bf16.mxu0 %v1517_v21  ;;  %v1515_v20 = vpack.c.bf16 %v1911_v25, %v1905_v23  ;;  %v1357_v21 = vsub.f32 %v2677_v61, %v2795_v32  ;;  %v1472_v25 = vmul.f32 1.442695, %v1361_v60 }
 0x666   :  { %v1915_v40 = vpop.eup %1914  ;;  %1940 = vpow2.f32 %v1486_v24 }
 0x667   :  { %v1917_v14 = vpop.eup %1916  ;;  %1942 = vpow2.f32 %v1488_v38  ;;  %v1509_v18 = vpack.c.bf16 %v1915_v40, %v2897_v36  ;;  %v1351_v36 = vsub.f32 %v2665_v55, %v2795_v32 }
 0x668   :  { %v1919_v16 = vpop.eup %1918  ;;  %1944 = vpow2.f32 %v1502_v13  ;;  %1543 = vmatpush1.bf16.msra.mxu0 %v1516_v7  ;;  %v1507_v13 = vpack.c.bf16 %v2865_v48, %v2861_v45  ;;  %v3147_v45 = vld [vmem:[#allocation5_spill] sm:$0xff]  ;;  %v1464_v7 = vmul.f32 1.442695, %v1357_v21 }
 0x669   :  { %v2905_v12 = vpop.eup %1920  ;;  %1946 = vpow2.f32 %v1378_v53  ;;  %1544 = vmatprep.subr.bf16.mxu0 %v1515_v20  ;;  %v1513_v1 = vpack.c.bf16 %v1919_v16, %v1917_v14  ;;  %v1354_v53 = vsub.f32 %v3145_v56, %v2783_v59  ;;  %v1353_v48 = vsub.f32 %v3147_v45, %v2795_v32  ;;  %v3149_v16 = vld [vmem:[#allocation17_spill] sm:$0xff]  ;;  %v3155_v56 = vld [vmem:[#allocation14_spill] sm:$0xff] }
 0x66a   :  { %v1923_v3 = vpop.eup %1922  ;;  %1948 = vpow2.f32 %v1382_v30  ;;  %v1452_v20 = vmul.f32 1.442695, %v1351_v36 }
 0x66b   :  { %v2913_v28 = vpop.eup %1924  ;;  %1950 = vpow2.f32 %v1504_v47  ;;  %v3148_v47 = vld [vmem:[#allocation21_spill] sm:$0xff]  ;;  %v1458_v54 = vmul.f32 1.442695, %v1354_v53 }
 0x66c   :  { %v1927_v8 = vpop.eup %1926  ;;  %1952 = vpow2.f32 %v1492_v34  ;;  %1545 = vmatpush1.bf16.msra.mxu0 %v1514_v22  ;;  %v1528_v11 = vpack.c.bf16 %v2913_v28, %v2905_v12  ;;  %v1347_v52 = vsub.f32 %v3148_v47, %v2795_v32  ;;  %v1350_v34 = vsub.f32 %v3149_v16, %v2783_v59  ;;  %v3156_v47 = vld [vmem:[#allocation10_spill] sm:$0xff] }
 0x66d   :  { %v2917_v35 = vpop.eup %1928  ;;  %1954 = vpow2.f32 %v1500_v57  ;;  %1546 = vmatprep.subr.bf16.mxu0 %v1513_v1  ;;  %v1511_v62 = vpack.c.bf16 %v1927_v8, %v1923_v3  ;;  %v3150_v3 = vld [vmem:[#allocation19_spill] sm:$0xff]  ;;  %v3151_v1 = vld [vmem:[#allocation20_spill] sm:$0xff] }
 0x66e   :  { %v2919_v37 = vpop.eup %1930  ;;  %1956 = vpow2.f32 %v1498_v15  ;;  %v1352_v26 = vsub.f32 %v3150_v3, %v2783_v59  ;;  %v1462_v15 = vmul.f32 1.442695, %v1356_v31  ;;  %v1349_v8 = vsub.f32 %v3151_v1, %v2795_v32 }
 0x66f   :  { %v2923_v50 = vpop.eup %1932  ;;  %1958 = vpow2.f32 %v1496_v5  ;;  %v1450_v0 = vmul.f32 1.442695, %v1350_v34 }
 0x670   :  { %v2925_v4 = vpop.eup %1934  ;;  %1547 = vmatpush1.bf16.msra.mxu0 %v1512_v17  ;;  %v1530_v23 = vpack.c.bf16 %v2923_v50, %v2917_v35  ;;  %1960 = vpow2.f32 %v1490_v29  ;;  %v1456_v29 = vmul.f32 1.442695, %v1353_v48  ;;  %v1444_v17 = vmul.f32 1.442695, %v1347_v52 }
 0x671   :  { %v2929_v63 = vpop.eup %1936  ;;  %1548 = vmatprep.subr.bf16.mxu0 %v1511_v62  ;;  %v1531_v49 = vpack.c.bf16 %v2925_v4, %v2919_v37  ;;  %1962 = vpow2.f32 %v1494_v6  ;;  %v3152_v62 = vld [vmem:[#allocation18_spill] sm:$0xff] }
 0x672   :  { %v2933_v19 = vpop.eup %1938  ;;  %1964 = vpow2.f32 %v1468_v39 }
 0x673   :  { %v2939_v2 = vpop.eup %1940  ;;  %1966 = vpow2.f32 %v1472_v25 }
 0x674   :  { %v2944_v24 = vpop.eup %1942  ;;  %1549 = vmatpush1.bf16.msra.mxu0 %v1510_v9  ;;  %v1532_v10 = vpack.c.bf16 %v2939_v2, %v2929_v63  ;;  %1968 = vpow2.f32 %v1460_v42  ;;  %v3153_v9 = vld [vmem:[#allocation22_spill] sm:$0xff] }
 0x675   :  { %v1945_v41 = vpop.eup %1944  ;;  %1550 = vmatprep.subr.bf16.mxu0 %v1509_v18  ;;  %v1533_v46 = vpack.c.bf16 %v2944_v24, %v2933_v19  ;;  %1970 = vpow2.f32 %v1464_v7  ;;  %v1346_v19 = vsub.f32 %v3152_v62, %v2783_v59  ;;  %v1348_v60 = vsub.f32 %v3153_v9, %v2783_v59 }
 0x676   :  { %v1947_v58 = vpop.eup %1946  ;;  %1972 = vpow2.f32 %v1452_v20  ;;  %v1454_v18 = vmul.f32 1.442695, %v1352_v26  ;;  %v2001_v26 = vld [vmem:[%s3005_s0 + $0x8] sm:$0xff] }
 0x677   :  { %v1949_v38 = vpop.eup %1948  ;;  %1974 = vpow2.f32 %v1458_v54  ;;  %v1442_v32 = vmul.f32 1.442695, %v1346_v19  ;;  %v2000_v54 = vld [vmem:[%s3008_s3] sm:$0xf] }
 0x678   :  { %v1951_v33 = vpop.eup %1950  ;;  %1551 = vmatpush1.bf16.msra.mxu0 %v1508_v51  ;;  %v1506_v61 = vpack.c.bf16 %v1949_v38, %v1947_v58  ;;  %1976 = vpow2.f32 %v1462_v15  ;;  %v1446_v58 = vmul.f32 1.442695, %v1348_v60 }
 0x679   :  { %v1953_v43 = vpop.eup %1952  ;;  %1552 = vmatprep.subr.bf16.mxu0 %v1507_v13  ;;  %1978 = vpow2.f32 %v1456_v29 }
 0x67a   :  { %v1955_v40 = vpop.eup %1954  ;;  %1980 = vpow2.f32 %v1444_v17 }
 0x67b   :  { %v1957_v30 = vpop.eup %1956  ;;  %v1537_v55 = vpack.c.bf16 %v1951_v33, %v1955_v40  ;;  %1982 = vpow2.f32 %v1450_v0 }
 0x67c   :  { %v1959_v14 = vpop.eup %1958  ;;  %1553 = vmatpush1.bf16.msra.mxu0 %v1506_v61  ;;  %v1536_v22 = vpack.c.bf16 %v1945_v41, %v1957_v30  ;;  %v1448_v41 = vmul.f32 1.442695, %v1349_v8  ;;  %1984 = vpow2.f32 %v1454_v18 }
 0x67d   :  { %1554 = vmatprep.subr.bf16.mxu0 %v1537_v55  ;;  %v1961_v57 = vpop.eup %1960  ;;  %v1535_v6 = vpack.c.bf16 %v1959_v14, %v1953_v43  ;;  %v3154_v43 = vld [vmem:[#allocation6_spill] sm:$0xff] }
 0x67e   :  { %v1963_v5 = vpop.eup %1962  ;;  %1986 = vpow2.f32 %v1448_v41  ;;  %v951_v53 = vadd.f32 %v3155_v56, %v3154_v43 }
 0x67f   :  { %v1534_v24 = vpack.c.bf16 %v1963_v5, %v1961_v57  ;;  %v1965_v27 = vpop.eup %1964  ;;  %1988 = vpow2.f32 %v1442_v32 }
 0x680   :  { %1555 = vmatpush2.bf16.msra.mxu0 %v1536_v22  ;;  %v1967_v39 = vpop.eup %1966  ;;  %1990 = vpow2.f32 %v1446_v58  ;;  %v959_v28 = vpack.c.bf16 %v951_v53, %v951_v53  ;;  %v3157_v22 = vld [vmem:[#allocation12_spill] sm:$0xff] }
 0x681   :  { %1556 = vmatprep.subr.bf16.mxu0 %v1535_v6  ;;  %v1969_v59 = vpop.eup %1968  ;;  %v1529_v51 = vpack.c.bf16 %v1967_v39, %v1965_v27 }
 0x682   :  { %v1971_v38 = vpop.eup %1970 }
 0x683   :  { %v1527_v13 = vpack.c.bf16 %v1971_v38, %v1969_v59 }
 0x684   :  { %1557 = vmatpush2.bf16.msra.mxu0 %v1534_v24 }
 0x685   :  { %1558 = vmatprep.subr.bf16.mxu0 %v1533_v46  ;;  %v1973_v46 = vpop.eup %1972 }
 0x686   :  { %v1975_v21 = vpop.eup %1974 }
 0x687   :  { %v1977_v25 = vpop.eup %1976 }
 0x688   :  { %1559 = vmatpush2.bf16.msra.mxu0 %v1532_v10  ;;  %v1979_v63 = vpop.eup %1978 }
 0x689   :  { %1560 = vmatprep.subr.bf16.mxu0 %v1531_v49  ;;  %v1981_v37 = vpop.eup %1980  ;;  %v1526_v49 = vpack.c.bf16 %v1977_v25, %v1975_v21  ;;  %v1525_v10 = vpack.c.bf16 %v1979_v63, %v1973_v46 }
 0x68a   :  { %v1983_v4 = vpop.eup %1982 }
 0x68b   :  { %v1985_v2 = vpop.eup %1984 }
 0x68c   :  { %1561 = vmatpush2.bf16.msra.mxu0 %v1530_v23  ;;  %v1987_v33 = vpop.eup %1986  ;;  %v1524_v50 = vpack.c.bf16 %v1985_v2, %v1983_v4 }
 0x68d   :  { %1562 = vmatprep.subr.bf16.mxu0 %v1529_v51  ;;  %v1989_v35 = vpop.eup %1988  ;;  %v1523_v36 = vpack.c.bf16 %v1987_v33, %v1981_v37 }
 0x68e   :  { %v1991_v23 = vpop.eup %1990 }
 0x68f   :  { %v1522_v12 = vpack.c.bf16 %v1991_v23, %v1989_v35 }
 0x690   :  { %1563 = vmatpush2.bf16.msra.mxu0 %v1528_v11 }
 0x691   :  { %1564 = vmatprep.subr.bf16.mxu0 %v1527_v13 }
 0x694   :  { %1565 = vmatpush2.bf16.msra.mxu0 %v1526_v49 }
 0x695   :  { %1566 = vmatprep.subr.bf16.mxu0 %v1525_v10 }
 0x698   :  { %1567 = vmatpush2.bf16.msra.mxu0 %v1524_v50 }
 0x699   :  { %1568 = vmatprep.subr.bf16.mxu0 %v1523_v36 }
 0x69c   :  { %1569 = vmatpush2.bf16.msra.mxu0 %v1522_v12 }
 0x69f   :  { %1571 = vmatmul.mubr.bf16.vlgmr.msra.gmra.mxu0 %v959_v28 }
 0x75f   :  { %v1572_v11 = vpop.f32.mrf.mxu0 }
 0x760   :  { %1992 = vrcp.f32 %v1572_v11 }
 0x761   :  { %v1574_v40 = vpop.f32.mrf.mxu0 }
 0x762   :  { %1994 = vrcp.f32 %v1574_v40 }
 0x763   :  { %v1576_v44 = vpop.f32.mrf.mxu0 }
 0x765   :  { %v1577_v31 = vpop.f32.mrf.mxu0 }
 0x76d   :  { %v1993_v42 = vpop.eup %1992 }
 0x76e   :  { %v1581_v61 = vmul.f32 %v1993_v42, %v1572_v11 }
 0x76f   :  { %v1995_v30 = vpop.eup %1994 }
 0x770   :  { %v1583_v45 = vsub.f32 2.0, %v1581_v61  ;;  %v1582_v48 = vmul.f32 %v1995_v30, %v1574_v40 }
 0x772   :  { %v1585_v7 = vmul.f32 %v1993_v42, %v1583_v45  ;;  %v1584_v55 = vsub.f32 2.0, %v1582_v48 }
 0x774   :  { %v1586_v14 = vmul.f32 %v1995_v30, %v1584_v55  ;;  %v1590_v52 = vrot.slane %v1585_v7, %v3156_v47 }
 0x776   :  { %v1594_v20 = vrot.slane %v1586_v14, %v3156_v47  ;;  %v1595_v34 = vmul.f32 %v1590_v52, %v1572_v11 }
 0x778   :  { %v1596_v16 = vmul.f32 %v1594_v20, %v1574_v40 }
 0x77a   :  { %1628 = vmatprep.subr.mxu1 %v1596_v16 }
 0x77b   :  { %1629 = vmatpush1.msra.mxu1 %v1595_v34 }
 0x77c   :  { %1725 = vmatmul.mubr.msk.f32.vlgmr.msra.gmra.mxu1 %vm179_vm2, %v2000_v54 }
 0x83c   :  { %v1664_v57 = vpop.f32.mrf.mxu1 }
 0x83d   :  { %v1665_v15 = vadd.f32 %v2001_v26, %v1664_v57 }
 0x83e   :  { %v1666_v3 = vpop.f32.mrf.mxu1 }
 0x83f   :  { %v1667_v5 = vadd.f32 %v1666_v3, %v3157_v22 }
 0x841   :  { %v1671_v1 = vcombine.low %v1665_v15, %v1667_v5 }
 0x843   :  { %1726 = vst [vmem:[%s3009_s4 + $0x8] sm:$0xff] %v1671_v1 }

</bundles_post_ra>
